<compile_context>
chip_gen: v7x
topology: tpu7x:2x2x1
jax: 0.10.0
libtpu: 0.0.40
codegen_flags: <defaults>
</compile_context>

<pallas_src>
import jax
import jax.numpy as jnp
from jax.experimental import pallas as pl
from jax.experimental.pallas import tpu as pltpu


# ----------------------------------------------------------------------------
# Fused forward kernel: GRU layers (unrolled over T) + fc1/relu/fc2/sigmoid.
# Everything lives in VMEM for the whole call; only safe ops are used
# (full / leading-index ref access, 2-D matmuls, static row/column slices,
# axis-0 concatenation), so no layout-changing reshapes are required.
# ----------------------------------------------------------------------------
def make_fused_kernel(n_layer, B, T, H1):
    def kernel(*refs):
        x_ref, hid0_ref = refs[0], refs[1]
        pos = 2
        layers = []
        for _ in range(n_layer):
            layers.append(refs[pos:pos + 4])        # (wih, whh, bih, bhh)
            pos += 4
        w1_ref, b1_ref, w2_ref, b2_ref = refs[pos:pos + 4]
        pos += 4
        pred_ref, hid_ref = refs[pos], refs[pos + 1]

        f32 = jnp.float32

        # Flatten input batch-major: row (b*T + t) == x[b, t, :].
        cur = jnp.concatenate([x_ref[b].astype(f32) for b in range(B)],
                              axis=0)               # (B*T, Fin)

        for l in range(n_layer):
            wih_ref, whh_ref, bih_ref, bhh_ref = layers[l]
            wih = wih_ref[...].astype(f32)          # (Fin, 3H)
            whh = whh_ref[...].astype(f32)          # (H,   3H)
            bih = bih_ref[...].astype(f32)          # (1,   3H)
            bhh = bhh_ref[...].astype(f32)          # (1,   3H)

            # Hoisted input->hidden matmul for all T timesteps at once.
            ih_all = jnp.dot(cur, wih, preferred_element_type=f32) + bih

            # Hoist the bias broadcast out of the unrolled time loop.
            bhh_b = jnp.broadcast_to(bhh, (B, 3 * H1))

            h = hid0_ref[l].astype(f32)             # (B, H1)
            outs = []
            for t in range(T):
                # Gather the per-timestep rows (b*T + t) for all b.
                ih_t = jnp.concatenate(
                    [ih_all[b * T + t:b * T + t + 1, :] for b in range(B)],
                    axis=0)                         # (B, 3H)
                # Single fused hidden->hidden matmul per step (r|z|n stacked).
                hh_t = jnp.dot(h, whh, preferred_element_type=f32) + bhh_b
                r = jax.nn.sigmoid(ih_t[:, 0:H1] + hh_t[:, 0:H1])
                z = jax.nn.sigmoid(ih_t[:, H1:2 * H1] + hh_t[:, H1:2 * H1])
                n = jnp.tanh(ih_t[:, 2 * H1:3 * H1] + r * hh_t[:, 2 * H1:3 * H1])
                h = (1.0 - z) * n + z * h
                outs.append(h)

            # Final hidden state of this layer (written once).
            hid_ref[l] = h.astype(hid_ref.dtype)

            # Re-assemble batch-major (b, t) rows for the next layer / head.
            cur = jnp.concatenate(
                [outs[t][b:b + 1, :] for b in range(B) for t in range(T)],
                axis=0)                             # (B*T, H1)

        # MLP head on all rows at once: fc1 -> relu -> fc2 -> sigmoid.
        y = jnp.dot(cur, w1_ref[...].astype(f32),
                    preferred_element_type=f32) + b1_ref[...].astype(f32)
        y = jnp.maximum(y, 0.0)
        y = jnp.dot(y, w2_ref[...].astype(f32),
                    preferred_element_type=f32) + b2_ref[...].astype(f32)
        y = jax.nn.sigmoid(y)                       # (B*T, O)

        # Store batch-first predictions (one contiguous block per batch row).
        for b in range(B):
            pred_ref[b] = y[b * T:(b + 1) * T, :].astype(pred_ref.dtype)

    return kernel


# ----------------------------------------------------------------------------
# Wrapper: single pallas_call, batch-first in / batch-first out, no transposes.
# ----------------------------------------------------------------------------
def rnn_dnn_forward(params, x, hid):
    B, T, F = x.shape
    n_layer = len(params["gru"])
    H1 = params["gru"][0]["whh"].shape[0]
    H2 = params["w1"].shape[-1]
    O = params["w2"].shape[-1]

    inputs = [x, hid]
    in_specs = [
        pl.BlockSpec((B, T, F), lambda i: (0, 0, 0)),
        pl.BlockSpec((n_layer, B, H1), lambda i: (0, 0, 0)),
    ]
    for l, p in enumerate(params["gru"]):
        fin = F if l == 0 else H1
        inputs += [p["wih"], p["whh"], p["bih"], p["bhh"]]
        in_specs += [
            pl.BlockSpec((fin, 3 * H1), lambda i: (0, 0)),
            pl.BlockSpec((H1, 3 * H1), lambda i: (0, 0)),
            pl.BlockSpec((1, 3 * H1), lambda i: (0, 0)),
            pl.BlockSpec((1, 3 * H1), lambda i: (0, 0)),
        ]
    inputs += [params["w1"], params["b1"], params["w2"], params["b2"]]
    in_specs += [
        pl.BlockSpec((H1, H2), lambda i: (0, 0)),
        pl.BlockSpec((1, H2), lambda i: (0, 0)),
        pl.BlockSpec((H2, O), lambda i: (0, 0)),
        pl.BlockSpec((1, O), lambda i: (0, 0)),
    ]

    predict, new_hid = pl.pallas_call(
        make_fused_kernel(n_layer, B, T, H1),
        out_shape=(jax.ShapeDtypeStruct((B, T, O), x.dtype),
                   jax.ShapeDtypeStruct((n_layer, B, H1), x.dtype)),
        grid_spec=pltpu.PrefetchScalarGridSpec(
            num_scalar_prefetch=0,
            grid=(1,),
            in_specs=in_specs,
            out_specs=(pl.BlockSpec((B, T, O), lambda i: (0, 0, 0)),
                       pl.BlockSpec((n_layer, B, H1), lambda i: (0, 0, 0))),
        ),
        compiler_params=pltpu.CompilerParams(
            dimension_semantics=("arbitrary",)),
    )(*inputs)
    return predict, new_hid


# ----------------------------------------------------------------------------
# Pure-JAX reference (lax.scan GRU, same gate-stacked weight layout).
# ----------------------------------------------------------------------------
def _ref_gru_layer(x_tm, h0, wih, whh, bih, bhh):
    H = h0.shape[-1]

    def step(h, x_t):
        ih = x_t @ wih + bih[0]
        hh = h @ whh + bhh[0]
        r = jax.nn.sigmoid(ih[:, 0:H] + hh[:, 0:H])
        z = jax.nn.sigmoid(ih[:, H:2 * H] + hh[:, H:2 * H])
        n = jnp.tanh(ih[:, 2 * H:3 * H] + r * hh[:, 2 * H:3 * H])
        h_new = (1.0 - z) * n + z * h
        return h_new, h_new

    h_last, outs = jax.lax.scan(step, h0, x_tm)
    return outs, h_last


def ref_forward(params, x, hid):
    x_tm = jnp.transpose(x, (1, 0, 2))
    new_hids = []
    inp = x_tm
    for l, p in enumerate(params["gru"]):
        out, h_last = _ref_gru_layer(inp, hid[l], p["wih"], p["whh"],
                                     p["bih"], p["bhh"])
        new_hids.append(h_last)
        inp = out
    y = jnp.maximum(out @ params["w1"] + params["b1"], 0.0)
    predict = jax.nn.sigmoid(y @ params["w2"] + params["b2"])
    return jnp.transpose(predict, (1, 0, 2)), jnp.stack(new_hids, axis=0)


# ----------------------------------------------------------------------------
# Deterministic parameter construction (shapes from the module __init__).
# Gate-stacked layout: wih (Fin, 3H), whh (H, 3H), biases (1, 3H), order r,z,n.
# ----------------------------------------------------------------------------
def init_params(key, feature_size, hidd_size1, hidd_size2, out_size, n_layer):
    glorot = jax.nn.initializers.glorot_uniform()
    ortho = jax.nn.initializers.orthogonal()
    gru_params = []
    for l in range(n_layer):
        fin = feature_size if l == 0 else hidd_size1
        key, k1, k2 = jax.random.split(key, 3)
        gru_params.append(dict(
            wih=glorot(k1, (fin, 3 * hidd_size1), jnp.float32),
            whh=ortho(k2, (hidd_size1, 3 * hidd_size1), jnp.float32),
            bih=jnp.zeros((1, 3 * hidd_size1), jnp.float32),
            bhh=jnp.zeros((1, 3 * hidd_size1), jnp.float32),
        ))
    key, k3, k4 = jax.random.split(key, 3)
    return dict(
        gru=gru_params,
        w1=glorot(k3, (hidd_size1, hidd_size2), jnp.float32),
        b1=jnp.zeros((1, hidd_size2), jnp.float32),
        w2=glorot(k4, (hidd_size2, out_size), jnp.float32),
        b2=jnp.zeros((1, out_size), jnp.float32),
    )


if __name__ == "__main__":
    # config: feature_size=16, hidd_size1=32, hidd_size2=32, out_size=8, n_layer=2
    B, T = 2, 8
    FEAT, H1, H2, OUT, NLAYER = 16, 32, 32, 8, 2

    key = jax.random.PRNGKey(0)
    kp, kx, kh = jax.random.split(key, 3)
    params = init_params(kp, FEAT, H1, H2, OUT, NLAYER)
    x = jax.random.normal(kx, (B, T, FEAT), jnp.float32)
    hid0 = jax.random.normal(kh, (NLAYER, B, H1), jnp.float32) * 0.1

    fwd = jax.jit(rnn_dnn_forward)
    predict, hid = fwd(params, x, hid0)
    predict = jax.block_until_ready(predict)
    hid = jax.block_until_ready(hid)

    # sanity check against pure-JAX reference
    ref_pred, ref_hid = ref_forward(params, x, hid0)
    assert predict.shape == (B, T, OUT) and hid.shape == (NLAYER, B, H1)
    assert jnp.allclose(predict, ref_pred, atol=2e-3, rtol=2e-3)
    assert jnp.allclose(hid, ref_hid, atol=2e-3, rtol=2e-3)

    print("KERNEL_OK")
</pallas_src>

<mosaic_0001>
module attributes {stable_mosaic.version = 11 : i64} {
  func.func @kernel(%arg0: i32, %arg1: memref<2x8x16xf32, #tpu.memory_space<vmem>>, %arg2: memref<2x2x32xf32, #tpu.memory_space<vmem>>, %arg3: memref<16x96xf32, #tpu.memory_space<vmem>>, %arg4: memref<32x96xf32, #tpu.memory_space<vmem>>, %arg5: memref<1x96xf32, #tpu.memory_space<vmem>>, %arg6: memref<1x96xf32, #tpu.memory_space<vmem>>, %arg7: memref<32x96xf32, #tpu.memory_space<vmem>>, %arg8: memref<32x96xf32, #tpu.memory_space<vmem>>, %arg9: memref<1x96xf32, #tpu.memory_space<vmem>>, %arg10: memref<1x96xf32, #tpu.memory_space<vmem>>, %arg11: memref<32x32xf32, #tpu.memory_space<vmem>>, %arg12: memref<1x32xf32, #tpu.memory_space<vmem>>, %arg13: memref<32x8xf32, #tpu.memory_space<vmem>>, %arg14: memref<1x8xf32, #tpu.memory_space<vmem>>, %arg15: memref<2x8x8xf32, #tpu.memory_space<vmem>>, %arg16: memref<2x2x32xf32, #tpu.memory_space<vmem>>) attributes {dimension_semantics = [#tpu.dimension_semantics<arbitrary>], iteration_bounds = array<i64: 1>, scalar_prefetch = 0 : i64, scratch_operands = 0 : i64, tpu.core_type = #tpu.core_type<tc>, window_params = [{pipeline_mode = #tpu.pipeline_mode<synchronous>, transform_indices = @transform_0, window_bounds = array<i64: 2, 8, 16>}, {pipeline_mode = #tpu.pipeline_mode<synchronous>, transform_indices = @transform_1, window_bounds = array<i64: 2, 2, 32>}, {pipeline_mode = #tpu.pipeline_mode<synchronous>, transform_indices = @transform_2, window_bounds = array<i64: 16, 96>}, {pipeline_mode = #tpu.pipeline_mode<synchronous>, transform_indices = @transform_3, window_bounds = array<i64: 32, 96>}, {pipeline_mode = #tpu.pipeline_mode<synchronous>, transform_indices = @transform_4, window_bounds = array<i64: 1, 96>}, {pipeline_mode = #tpu.pipeline_mode<synchronous>, transform_indices = @transform_5, window_bounds = array<i64: 1, 96>}, {pipeline_mode = #tpu.pipeline_mode<synchronous>, transform_indices = @transform_6, window_bounds = array<i64: 32, 96>}, {pipeline_mode = #tpu.pipeline_mode<synchronous>, transform_indices = @transform_7, window_bounds = array<i64: 32, 96>}, {pipeline_mode = #tpu.pipeline_mode<synchronous>, transform_indices = @transform_8, window_bounds = array<i64: 1, 96>}, {pipeline_mode = #tpu.pipeline_mode<synchronous>, transform_indices = @transform_9, window_bounds = array<i64: 1, 96>}, {pipeline_mode = #tpu.pipeline_mode<synchronous>, transform_indices = @transform_10, window_bounds = array<i64: 32, 32>}, {pipeline_mode = #tpu.pipeline_mode<synchronous>, transform_indices = @transform_11, window_bounds = array<i64: 1, 32>}, {pipeline_mode = #tpu.pipeline_mode<synchronous>, transform_indices = @transform_12, window_bounds = array<i64: 32, 8>}, {pipeline_mode = #tpu.pipeline_mode<synchronous>, transform_indices = @transform_13, window_bounds = array<i64: 1, 8>}, {pipeline_mode = #tpu.pipeline_mode<synchronous>, transform_indices = @transform_14, window_bounds = array<i64: 2, 8, 8>}, {pipeline_mode = #tpu.pipeline_mode<synchronous>, transform_indices = @transform_15, window_bounds = array<i64: 2, 2, 32>}]} {
    %c0 = arith.constant 0 : index
    %c0_0 = arith.constant 0 : index
    %c0_1 = arith.constant 0 : index
    %0 = vector.load %arg1[%c0, %c0_0, %c0_1] : memref<2x8x16xf32, #tpu.memory_space<vmem>>, vector<1x8x16xf32>
    %1 = vector.shape_cast %0 : vector<1x8x16xf32> to vector<8x16xf32>
    %c1 = arith.constant 1 : index
    %c0_2 = arith.constant 0 : index
    %c0_3 = arith.constant 0 : index
    %2 = vector.load %arg1[%c1, %c0_2, %c0_3] : memref<2x8x16xf32, #tpu.memory_space<vmem>>, vector<1x8x16xf32>
    %3 = vector.shape_cast %2 : vector<1x8x16xf32> to vector<8x16xf32>
    %4 = tpu.concatenate %1, %3 in 0 : vector<8x16xf32>, vector<8x16xf32> -> vector<16x16xf32>
    %c0_4 = arith.constant 0 : index
    %c0_5 = arith.constant 0 : index
    %5 = vector.load %arg3[%c0_4, %c0_5] : memref<16x96xf32, #tpu.memory_space<vmem>>, vector<16x96xf32>
    %c0_6 = arith.constant 0 : index
    %c0_7 = arith.constant 0 : index
    %6 = vector.load %arg4[%c0_6, %c0_7] : memref<32x96xf32, #tpu.memory_space<vmem>>, vector<32x96xf32>
    %c0_8 = arith.constant 0 : index
    %c0_9 = arith.constant 0 : index
    %7 = vector.load %arg5[%c0_8, %c0_9] : memref<1x96xf32, #tpu.memory_space<vmem>>, vector<1x96xf32>
    %c0_10 = arith.constant 0 : index
    %c0_11 = arith.constant 0 : index
    %8 = vector.load %arg6[%c0_10, %c0_11] : memref<1x96xf32, #tpu.memory_space<vmem>>, vector<1x96xf32>
    %cst = arith.constant dense<0.000000e+00> : vector<16x96xf32>
    %9 = tpu.matmul %4, %5, %cst {dimension_numbers = #tpu.dot_dimension_numbers<[1], [0], [0], [1], [0, 0, 1, 1], [], []>} : vector<16x16xf32>, vector<16x96xf32>, vector<16x96xf32> -> vector<16x96xf32>
    %10 = vector.broadcast %7 : vector<1x96xf32> to vector<16x96xf32>
    %11 = arith.addf %9, %10 : vector<16x96xf32>
    %12 = vector.shape_cast %8 : vector<1x96xf32> to vector<1x96xf32>
    %13 = vector.broadcast %12 : vector<1x96xf32> to vector<2x96xf32>
    %c0_12 = arith.constant 0 : index
    %c0_13 = arith.constant 0 : index
    %c0_14 = arith.constant 0 : index
    %14 = vector.load %arg2[%c0_12, %c0_13, %c0_14] : memref<2x2x32xf32, #tpu.memory_space<vmem>>, vector<1x2x32xf32>
    %15 = vector.shape_cast %14 : vector<1x2x32xf32> to vector<2x32xf32>
    %16 = vector.extract_strided_slice %11 {offsets = [0, 0], sizes = [1, 96], strides = [1, 1]} : vector<16x96xf32> to vector<1x96xf32>
    %17 = vector.extract_strided_slice %11 {offsets = [8, 0], sizes = [1, 96], strides = [1, 1]} : vector<16x96xf32> to vector<1x96xf32>
    %18 = tpu.concatenate %16, %17 in 0 : vector<1x96xf32>, vector<1x96xf32> -> vector<2x96xf32>
    %cst_15 = arith.constant dense<0.000000e+00> : vector<2x96xf32>
    %19 = tpu.matmul %15, %6, %cst_15 {dimension_numbers = #tpu.dot_dimension_numbers<[1], [0], [0], [1], [0, 0, 1, 1], [], []>} : vector<2x32xf32>, vector<32x96xf32>, vector<2x96xf32> -> vector<2x96xf32>
    %20 = arith.addf %19, %13 : vector<2x96xf32>
    %21 = vector.extract_strided_slice %18 {offsets = [0, 0], sizes = [2, 32], strides = [1, 1]} : vector<2x96xf32> to vector<2x32xf32>
    %22 = vector.extract_strided_slice %20 {offsets = [0, 0], sizes = [2, 32], strides = [1, 1]} : vector<2x96xf32> to vector<2x32xf32>
    %23 = arith.addf %21, %22 : vector<2x32xf32>
    %24 = arith.negf %23 : vector<2x32xf32>
    %25 = math.exp %24 : vector<2x32xf32>
    %cst_16 = arith.constant 1.000000e+00 : f32
    %26 = vector.broadcast %cst_16 : f32 to vector<2x32xf32>
    %27 = arith.addf %26, %25 : vector<2x32xf32>
    %28 = arith.divf %26, %27 : vector<2x32xf32>
    %29 = vector.extract_strided_slice %18 {offsets = [0, 32], sizes = [2, 32], strides = [1, 1]} : vector<2x96xf32> to vector<2x32xf32>
    %30 = vector.extract_strided_slice %20 {offsets = [0, 32], sizes = [2, 32], strides = [1, 1]} : vector<2x96xf32> to vector<2x32xf32>
    %31 = arith.addf %29, %30 : vector<2x32xf32>
    %32 = arith.negf %31 : vector<2x32xf32>
    %33 = math.exp %32 : vector<2x32xf32>
    %cst_17 = arith.constant 1.000000e+00 : f32
    %34 = vector.broadcast %cst_17 : f32 to vector<2x32xf32>
    %35 = arith.addf %34, %33 : vector<2x32xf32>
    %36 = arith.divf %34, %35 : vector<2x32xf32>
    %37 = vector.extract_strided_slice %18 {offsets = [0, 64], sizes = [2, 32], strides = [1, 1]} : vector<2x96xf32> to vector<2x32xf32>
    %38 = vector.extract_strided_slice %20 {offsets = [0, 64], sizes = [2, 32], strides = [1, 1]} : vector<2x96xf32> to vector<2x32xf32>
    %39 = arith.mulf %28, %38 : vector<2x32xf32>
    %40 = arith.addf %37, %39 : vector<2x32xf32>
    %41 = math.tanh %40 : vector<2x32xf32>
    %cst_18 = arith.constant 1.000000e+00 : f32
    %42 = vector.broadcast %cst_18 : f32 to vector<2x32xf32>
    %43 = arith.subf %42, %36 : vector<2x32xf32>
    %44 = arith.mulf %43, %41 : vector<2x32xf32>
    %45 = arith.mulf %36, %15 : vector<2x32xf32>
    %46 = arith.addf %44, %45 : vector<2x32xf32>
    %47 = vector.extract_strided_slice %11 {offsets = [1, 0], sizes = [1, 96], strides = [1, 1]} : vector<16x96xf32> to vector<1x96xf32>
    %48 = vector.extract_strided_slice %11 {offsets = [9, 0], sizes = [1, 96], strides = [1, 1]} : vector<16x96xf32> to vector<1x96xf32>
    %49 = tpu.concatenate %47, %48 in 0 : vector<1x96xf32>, vector<1x96xf32> -> vector<2x96xf32>
    %cst_19 = arith.constant dense<0.000000e+00> : vector<2x96xf32>
    %50 = tpu.matmul %46, %6, %cst_19 {dimension_numbers = #tpu.dot_dimension_numbers<[1], [0], [0], [1], [0, 0, 1, 1], [], []>} : vector<2x32xf32>, vector<32x96xf32>, vector<2x96xf32> -> vector<2x96xf32>
    %51 = arith.addf %50, %13 : vector<2x96xf32>
    %52 = vector.extract_strided_slice %49 {offsets = [0, 0], sizes = [2, 32], strides = [1, 1]} : vector<2x96xf32> to vector<2x32xf32>
    %53 = vector.extract_strided_slice %51 {offsets = [0, 0], sizes = [2, 32], strides = [1, 1]} : vector<2x96xf32> to vector<2x32xf32>
    %54 = arith.addf %52, %53 : vector<2x32xf32>
    %55 = arith.negf %54 : vector<2x32xf32>
    %56 = math.exp %55 : vector<2x32xf32>
    %cst_20 = arith.constant 1.000000e+00 : f32
    %57 = vector.broadcast %cst_20 : f32 to vector<2x32xf32>
    %58 = arith.addf %57, %56 : vector<2x32xf32>
    %59 = arith.divf %57, %58 : vector<2x32xf32>
    %60 = vector.extract_strided_slice %49 {offsets = [0, 32], sizes = [2, 32], strides = [1, 1]} : vector<2x96xf32> to vector<2x32xf32>
    %61 = vector.extract_strided_slice %51 {offsets = [0, 32], sizes = [2, 32], strides = [1, 1]} : vector<2x96xf32> to vector<2x32xf32>
    %62 = arith.addf %60, %61 : vector<2x32xf32>
    %63 = arith.negf %62 : vector<2x32xf32>
    %64 = math.exp %63 : vector<2x32xf32>
    %cst_21 = arith.constant 1.000000e+00 : f32
    %65 = vector.broadcast %cst_21 : f32 to vector<2x32xf32>
    %66 = arith.addf %65, %64 : vector<2x32xf32>
    %67 = arith.divf %65, %66 : vector<2x32xf32>
    %68 = vector.extract_strided_slice %49 {offsets = [0, 64], sizes = [2, 32], strides = [1, 1]} : vector<2x96xf32> to vector<2x32xf32>
    %69 = vector.extract_strided_slice %51 {offsets = [0, 64], sizes = [2, 32], strides = [1, 1]} : vector<2x96xf32> to vector<2x32xf32>
    %70 = arith.mulf %59, %69 : vector<2x32xf32>
    %71 = arith.addf %68, %70 : vector<2x32xf32>
    %72 = math.tanh %71 : vector<2x32xf32>
    %cst_22 = arith.constant 1.000000e+00 : f32
    %73 = vector.broadcast %cst_22 : f32 to vector<2x32xf32>
    %74 = arith.subf %73, %67 : vector<2x32xf32>
    %75 = arith.mulf %74, %72 : vector<2x32xf32>
    %76 = arith.mulf %67, %46 : vector<2x32xf32>
    %77 = arith.addf %75, %76 : vector<2x32xf32>
    %78 = vector.extract_strided_slice %11 {offsets = [2, 0], sizes = [1, 96], strides = [1, 1]} : vector<16x96xf32> to vector<1x96xf32>
    %79 = vector.extract_strided_slice %11 {offsets = [10, 0], sizes = [1, 96], strides = [1, 1]} : vector<16x96xf32> to vector<1x96xf32>
    %80 = tpu.concatenate %78, %79 in 0 : vector<1x96xf32>, vector<1x96xf32> -> vector<2x96xf32>
    %cst_23 = arith.constant dense<0.000000e+00> : vector<2x96xf32>
    %81 = tpu.matmul %77, %6, %cst_23 {dimension_numbers = #tpu.dot_dimension_numbers<[1], [0], [0], [1], [0, 0, 1, 1], [], []>} : vector<2x32xf32>, vector<32x96xf32>, vector<2x96xf32> -> vector<2x96xf32>
    %82 = arith.addf %81, %13 : vector<2x96xf32>
    %83 = vector.extract_strided_slice %80 {offsets = [0, 0], sizes = [2, 32], strides = [1, 1]} : vector<2x96xf32> to vector<2x32xf32>
    %84 = vector.extract_strided_slice %82 {offsets = [0, 0], sizes = [2, 32], strides = [1, 1]} : vector<2x96xf32> to vector<2x32xf32>
    %85 = arith.addf %83, %84 : vector<2x32xf32>
    %86 = arith.negf %85 : vector<2x32xf32>
    %87 = math.exp %86 : vector<2x32xf32>
    %cst_24 = arith.constant 1.000000e+00 : f32
    %88 = vector.broadcast %cst_24 : f32 to vector<2x32xf32>
    %89 = arith.addf %88, %87 : vector<2x32xf32>
    %90 = arith.divf %88, %89 : vector<2x32xf32>
    %91 = vector.extract_strided_slice %80 {offsets = [0, 32], sizes = [2, 32], strides = [1, 1]} : vector<2x96xf32> to vector<2x32xf32>
    %92 = vector.extract_strided_slice %82 {offsets = [0, 32], sizes = [2, 32], strides = [1, 1]} : vector<2x96xf32> to vector<2x32xf32>
    %93 = arith.addf %91, %92 : vector<2x32xf32>
    %94 = arith.negf %93 : vector<2x32xf32>
    %95 = math.exp %94 : vector<2x32xf32>
    %cst_25 = arith.constant 1.000000e+00 : f32
    %96 = vector.broadcast %cst_25 : f32 to vector<2x32xf32>
    %97 = arith.addf %96, %95 : vector<2x32xf32>
    %98 = arith.divf %96, %97 : vector<2x32xf32>
    %99 = vector.extract_strided_slice %80 {offsets = [0, 64], sizes = [2, 32], strides = [1, 1]} : vector<2x96xf32> to vector<2x32xf32>
    %100 = vector.extract_strided_slice %82 {offsets = [0, 64], sizes = [2, 32], strides = [1, 1]} : vector<2x96xf32> to vector<2x32xf32>
    %101 = arith.mulf %90, %100 : vector<2x32xf32>
    %102 = arith.addf %99, %101 : vector<2x32xf32>
    %103 = math.tanh %102 : vector<2x32xf32>
    %cst_26 = arith.constant 1.000000e+00 : f32
    %104 = vector.broadcast %cst_26 : f32 to vector<2x32xf32>
    %105 = arith.subf %104, %98 : vector<2x32xf32>
    %106 = arith.mulf %105, %103 : vector<2x32xf32>
    %107 = arith.mulf %98, %77 : vector<2x32xf32>
    %108 = arith.addf %106, %107 : vector<2x32xf32>
    %109 = vector.extract_strided_slice %11 {offsets = [3, 0], sizes = [1, 96], strides = [1, 1]} : vector<16x96xf32> to vector<1x96xf32>
    %110 = vector.extract_strided_slice %11 {offsets = [11, 0], sizes = [1, 96], strides = [1, 1]} : vector<16x96xf32> to vector<1x96xf32>
    %111 = tpu.concatenate %109, %110 in 0 : vector<1x96xf32>, vector<1x96xf32> -> vector<2x96xf32>
    %cst_27 = arith.constant dense<0.000000e+00> : vector<2x96xf32>
    %112 = tpu.matmul %108, %6, %cst_27 {dimension_numbers = #tpu.dot_dimension_numbers<[1], [0], [0], [1], [0, 0, 1, 1], [], []>} : vector<2x32xf32>, vector<32x96xf32>, vector<2x96xf32> -> vector<2x96xf32>
    %113 = arith.addf %112, %13 : vector<2x96xf32>
    %114 = vector.extract_strided_slice %111 {offsets = [0, 0], sizes = [2, 32], strides = [1, 1]} : vector<2x96xf32> to vector<2x32xf32>
    %115 = vector.extract_strided_slice %113 {offsets = [0, 0], sizes = [2, 32], strides = [1, 1]} : vector<2x96xf32> to vector<2x32xf32>
    %116 = arith.addf %114, %115 : vector<2x32xf32>
    %117 = arith.negf %116 : vector<2x32xf32>
    %118 = math.exp %117 : vector<2x32xf32>
    %cst_28 = arith.constant 1.000000e+00 : f32
    %119 = vector.broadcast %cst_28 : f32 to vector<2x32xf32>
    %120 = arith.addf %119, %118 : vector<2x32xf32>
    %121 = arith.divf %119, %120 : vector<2x32xf32>
    %122 = vector.extract_strided_slice %111 {offsets = [0, 32], sizes = [2, 32], strides = [1, 1]} : vector<2x96xf32> to vector<2x32xf32>
    %123 = vector.extract_strided_slice %113 {offsets = [0, 32], sizes = [2, 32], strides = [1, 1]} : vector<2x96xf32> to vector<2x32xf32>
    %124 = arith.addf %122, %123 : vector<2x32xf32>
    %125 = arith.negf %124 : vector<2x32xf32>
    %126 = math.exp %125 : vector<2x32xf32>
    %cst_29 = arith.constant 1.000000e+00 : f32
    %127 = vector.broadcast %cst_29 : f32 to vector<2x32xf32>
    %128 = arith.addf %127, %126 : vector<2x32xf32>
    %129 = arith.divf %127, %128 : vector<2x32xf32>
    %130 = vector.extract_strided_slice %111 {offsets = [0, 64], sizes = [2, 32], strides = [1, 1]} : vector<2x96xf32> to vector<2x32xf32>
    %131 = vector.extract_strided_slice %113 {offsets = [0, 64], sizes = [2, 32], strides = [1, 1]} : vector<2x96xf32> to vector<2x32xf32>
    %132 = arith.mulf %121, %131 : vector<2x32xf32>
    %133 = arith.addf %130, %132 : vector<2x32xf32>
    %134 = math.tanh %133 : vector<2x32xf32>
    %cst_30 = arith.constant 1.000000e+00 : f32
    %135 = vector.broadcast %cst_30 : f32 to vector<2x32xf32>
    %136 = arith.subf %135, %129 : vector<2x32xf32>
    %137 = arith.mulf %136, %134 : vector<2x32xf32>
    %138 = arith.mulf %129, %108 : vector<2x32xf32>
    %139 = arith.addf %137, %138 : vector<2x32xf32>
    %140 = vector.extract_strided_slice %11 {offsets = [4, 0], sizes = [1, 96], strides = [1, 1]} : vector<16x96xf32> to vector<1x96xf32>
    %141 = vector.extract_strided_slice %11 {offsets = [12, 0], sizes = [1, 96], strides = [1, 1]} : vector<16x96xf32> to vector<1x96xf32>
    %142 = tpu.concatenate %140, %141 in 0 : vector<1x96xf32>, vector<1x96xf32> -> vector<2x96xf32>
    %cst_31 = arith.constant dense<0.000000e+00> : vector<2x96xf32>
    %143 = tpu.matmul %139, %6, %cst_31 {dimension_numbers = #tpu.dot_dimension_numbers<[1], [0], [0], [1], [0, 0, 1, 1], [], []>} : vector<2x32xf32>, vector<32x96xf32>, vector<2x96xf32> -> vector<2x96xf32>
    %144 = arith.addf %143, %13 : vector<2x96xf32>
    %145 = vector.extract_strided_slice %142 {offsets = [0, 0], sizes = [2, 32], strides = [1, 1]} : vector<2x96xf32> to vector<2x32xf32>
    %146 = vector.extract_strided_slice %144 {offsets = [0, 0], sizes = [2, 32], strides = [1, 1]} : vector<2x96xf32> to vector<2x32xf32>
    %147 = arith.addf %145, %146 : vector<2x32xf32>
    %148 = arith.negf %147 : vector<2x32xf32>
    %149 = math.exp %148 : vector<2x32xf32>
    %cst_32 = arith.constant 1.000000e+00 : f32
    %150 = vector.broadcast %cst_32 : f32 to vector<2x32xf32>
    %151 = arith.addf %150, %149 : vector<2x32xf32>
    %152 = arith.divf %150, %151 : vector<2x32xf32>
    %153 = vector.extract_strided_slice %142 {offsets = [0, 32], sizes = [2, 32], strides = [1, 1]} : vector<2x96xf32> to vector<2x32xf32>
    %154 = vector.extract_strided_slice %144 {offsets = [0, 32], sizes = [2, 32], strides = [1, 1]} : vector<2x96xf32> to vector<2x32xf32>
    %155 = arith.addf %153, %154 : vector<2x32xf32>
    %156 = arith.negf %155 : vector<2x32xf32>
    %157 = math.exp %156 : vector<2x32xf32>
    %cst_33 = arith.constant 1.000000e+00 : f32
    %158 = vector.broadcast %cst_33 : f32 to vector<2x32xf32>
    %159 = arith.addf %158, %157 : vector<2x32xf32>
    %160 = arith.divf %158, %159 : vector<2x32xf32>
    %161 = vector.extract_strided_slice %142 {offsets = [0, 64], sizes = [2, 32], strides = [1, 1]} : vector<2x96xf32> to vector<2x32xf32>
    %162 = vector.extract_strided_slice %144 {offsets = [0, 64], sizes = [2, 32], strides = [1, 1]} : vector<2x96xf32> to vector<2x32xf32>
    %163 = arith.mulf %152, %162 : vector<2x32xf32>
    %164 = arith.addf %161, %163 : vector<2x32xf32>
    %165 = math.tanh %164 : vector<2x32xf32>
    %cst_34 = arith.constant 1.000000e+00 : f32
    %166 = vector.broadcast %cst_34 : f32 to vector<2x32xf32>
    %167 = arith.subf %166, %160 : vector<2x32xf32>
    %168 = arith.mulf %167, %165 : vector<2x32xf32>
    %169 = arith.mulf %160, %139 : vector<2x32xf32>
    %170 = arith.addf %168, %169 : vector<2x32xf32>
    %171 = vector.extract_strided_slice %11 {offsets = [5, 0], sizes = [1, 96], strides = [1, 1]} : vector<16x96xf32> to vector<1x96xf32>
    %172 = vector.extract_strided_slice %11 {offsets = [13, 0], sizes = [1, 96], strides = [1, 1]} : vector<16x96xf32> to vector<1x96xf32>
    %173 = tpu.concatenate %171, %172 in 0 : vector<1x96xf32>, vector<1x96xf32> -> vector<2x96xf32>
    %cst_35 = arith.constant dense<0.000000e+00> : vector<2x96xf32>
    %174 = tpu.matmul %170, %6, %cst_35 {dimension_numbers = #tpu.dot_dimension_numbers<[1], [0], [0], [1], [0, 0, 1, 1], [], []>} : vector<2x32xf32>, vector<32x96xf32>, vector<2x96xf32> -> vector<2x96xf32>
    %175 = arith.addf %174, %13 : vector<2x96xf32>
    %176 = vector.extract_strided_slice %173 {offsets = [0, 0], sizes = [2, 32], strides = [1, 1]} : vector<2x96xf32> to vector<2x32xf32>
    %177 = vector.extract_strided_slice %175 {offsets = [0, 0], sizes = [2, 32], strides = [1, 1]} : vector<2x96xf32> to vector<2x32xf32>
    %178 = arith.addf %176, %177 : vector<2x32xf32>
    %179 = arith.negf %178 : vector<2x32xf32>
    %180 = math.exp %179 : vector<2x32xf32>
    %cst_36 = arith.constant 1.000000e+00 : f32
    %181 = vector.broadcast %cst_36 : f32 to vector<2x32xf32>
    %182 = arith.addf %181, %180 : vector<2x32xf32>
    %183 = arith.divf %181, %182 : vector<2x32xf32>
    %184 = vector.extract_strided_slice %173 {offsets = [0, 32], sizes = [2, 32], strides = [1, 1]} : vector<2x96xf32> to vector<2x32xf32>
    %185 = vector.extract_strided_slice %175 {offsets = [0, 32], sizes = [2, 32], strides = [1, 1]} : vector<2x96xf32> to vector<2x32xf32>
    %186 = arith.addf %184, %185 : vector<2x32xf32>
    %187 = arith.negf %186 : vector<2x32xf32>
    %188 = math.exp %187 : vector<2x32xf32>
    %cst_37 = arith.constant 1.000000e+00 : f32
    %189 = vector.broadcast %cst_37 : f32 to vector<2x32xf32>
    %190 = arith.addf %189, %188 : vector<2x32xf32>
    %191 = arith.divf %189, %190 : vector<2x32xf32>
    %192 = vector.extract_strided_slice %173 {offsets = [0, 64], sizes = [2, 32], strides = [1, 1]} : vector<2x96xf32> to vector<2x32xf32>
    %193 = vector.extract_strided_slice %175 {offsets = [0, 64], sizes = [2, 32], strides = [1, 1]} : vector<2x96xf32> to vector<2x32xf32>
    %194 = arith.mulf %183, %193 : vector<2x32xf32>
    %195 = arith.addf %192, %194 : vector<2x32xf32>
    %196 = math.tanh %195 : vector<2x32xf32>
    %cst_38 = arith.constant 1.000000e+00 : f32
    %197 = vector.broadcast %cst_38 : f32 to vector<2x32xf32>
    %198 = arith.subf %197, %191 : vector<2x32xf32>
    %199 = arith.mulf %198, %196 : vector<2x32xf32>
    %200 = arith.mulf %191, %170 : vector<2x32xf32>
    %201 = arith.addf %199, %200 : vector<2x32xf32>
    %202 = vector.extract_strided_slice %11 {offsets = [6, 0], sizes = [1, 96], strides = [1, 1]} : vector<16x96xf32> to vector<1x96xf32>
    %203 = vector.extract_strided_slice %11 {offsets = [14, 0], sizes = [1, 96], strides = [1, 1]} : vector<16x96xf32> to vector<1x96xf32>
    %204 = tpu.concatenate %202, %203 in 0 : vector<1x96xf32>, vector<1x96xf32> -> vector<2x96xf32>
    %cst_39 = arith.constant dense<0.000000e+00> : vector<2x96xf32>
    %205 = tpu.matmul %201, %6, %cst_39 {dimension_numbers = #tpu.dot_dimension_numbers<[1], [0], [0], [1], [0, 0, 1, 1], [], []>} : vector<2x32xf32>, vector<32x96xf32>, vector<2x96xf32> -> vector<2x96xf32>
    %206 = arith.addf %205, %13 : vector<2x96xf32>
    %207 = vector.extract_strided_slice %204 {offsets = [0, 0], sizes = [2, 32], strides = [1, 1]} : vector<2x96xf32> to vector<2x32xf32>
    %208 = vector.extract_strided_slice %206 {offsets = [0, 0], sizes = [2, 32], strides = [1, 1]} : vector<2x96xf32> to vector<2x32xf32>
    %209 = arith.addf %207, %208 : vector<2x32xf32>
    %210 = arith.negf %209 : vector<2x32xf32>
    %211 = math.exp %210 : vector<2x32xf32>
    %cst_40 = arith.constant 1.000000e+00 : f32
    %212 = vector.broadcast %cst_40 : f32 to vector<2x32xf32>
    %213 = arith.addf %212, %211 : vector<2x32xf32>
    %214 = arith.divf %212, %213 : vector<2x32xf32>
    %215 = vector.extract_strided_slice %204 {offsets = [0, 32], sizes = [2, 32], strides = [1, 1]} : vector<2x96xf32> to vector<2x32xf32>
    %216 = vector.extract_strided_slice %206 {offsets = [0, 32], sizes = [2, 32], strides = [1, 1]} : vector<2x96xf32> to vector<2x32xf32>
    %217 = arith.addf %215, %216 : vector<2x32xf32>
    %218 = arith.negf %217 : vector<2x32xf32>
    %219 = math.exp %218 : vector<2x32xf32>
    %cst_41 = arith.constant 1.000000e+00 : f32
    %220 = vector.broadcast %cst_41 : f32 to vector<2x32xf32>
    %221 = arith.addf %220, %219 : vector<2x32xf32>
    %222 = arith.divf %220, %221 : vector<2x32xf32>
    %223 = vector.extract_strided_slice %204 {offsets = [0, 64], sizes = [2, 32], strides = [1, 1]} : vector<2x96xf32> to vector<2x32xf32>
    %224 = vector.extract_strided_slice %206 {offsets = [0, 64], sizes = [2, 32], strides = [1, 1]} : vector<2x96xf32> to vector<2x32xf32>
    %225 = arith.mulf %214, %224 : vector<2x32xf32>
    %226 = arith.addf %223, %225 : vector<2x32xf32>
    %227 = math.tanh %226 : vector<2x32xf32>
    %cst_42 = arith.constant 1.000000e+00 : f32
    %228 = vector.broadcast %cst_42 : f32 to vector<2x32xf32>
    %229 = arith.subf %228, %222 : vector<2x32xf32>
    %230 = arith.mulf %229, %227 : vector<2x32xf32>
    %231 = arith.mulf %222, %201 : vector<2x32xf32>
    %232 = arith.addf %230, %231 : vector<2x32xf32>
    %233 = vector.extract_strided_slice %11 {offsets = [7, 0], sizes = [1, 96], strides = [1, 1]} : vector<16x96xf32> to vector<1x96xf32>
    %234 = vector.extract_strided_slice %11 {offsets = [15, 0], sizes = [1, 96], strides = [1, 1]} : vector<16x96xf32> to vector<1x96xf32>
    %235 = tpu.concatenate %233, %234 in 0 : vector<1x96xf32>, vector<1x96xf32> -> vector<2x96xf32>
    %cst_43 = arith.constant dense<0.000000e+00> : vector<2x96xf32>
    %236 = tpu.matmul %232, %6, %cst_43 {dimension_numbers = #tpu.dot_dimension_numbers<[1], [0], [0], [1], [0, 0, 1, 1], [], []>} : vector<2x32xf32>, vector<32x96xf32>, vector<2x96xf32> -> vector<2x96xf32>
    %237 = arith.addf %236, %13 : vector<2x96xf32>
    %238 = vector.extract_strided_slice %235 {offsets = [0, 0], sizes = [2, 32], strides = [1, 1]} : vector<2x96xf32> to vector<2x32xf32>
    %239 = vector.extract_strided_slice %237 {offsets = [0, 0], sizes = [2, 32], strides = [1, 1]} : vector<2x96xf32> to vector<2x32xf32>
    %240 = arith.addf %238, %239 : vector<2x32xf32>
    %241 = arith.negf %240 : vector<2x32xf32>
    %242 = math.exp %241 : vector<2x32xf32>
    %cst_44 = arith.constant 1.000000e+00 : f32
    %243 = vector.broadcast %cst_44 : f32 to vector<2x32xf32>
    %244 = arith.addf %243, %242 : vector<2x32xf32>
    %245 = arith.divf %243, %244 : vector<2x32xf32>
    %246 = vector.extract_strided_slice %235 {offsets = [0, 32], sizes = [2, 32], strides = [1, 1]} : vector<2x96xf32> to vector<2x32xf32>
    %247 = vector.extract_strided_slice %237 {offsets = [0, 32], sizes = [2, 32], strides = [1, 1]} : vector<2x96xf32> to vector<2x32xf32>
    %248 = arith.addf %246, %247 : vector<2x32xf32>
    %249 = arith.negf %248 : vector<2x32xf32>
    %250 = math.exp %249 : vector<2x32xf32>
    %cst_45 = arith.constant 1.000000e+00 : f32
    %251 = vector.broadcast %cst_45 : f32 to vector<2x32xf32>
    %252 = arith.addf %251, %250 : vector<2x32xf32>
    %253 = arith.divf %251, %252 : vector<2x32xf32>
    %254 = vector.extract_strided_slice %235 {offsets = [0, 64], sizes = [2, 32], strides = [1, 1]} : vector<2x96xf32> to vector<2x32xf32>
    %255 = vector.extract_strided_slice %237 {offsets = [0, 64], sizes = [2, 32], strides = [1, 1]} : vector<2x96xf32> to vector<2x32xf32>
    %256 = arith.mulf %245, %255 : vector<2x32xf32>
    %257 = arith.addf %254, %256 : vector<2x32xf32>
    %258 = math.tanh %257 : vector<2x32xf32>
    %cst_46 = arith.constant 1.000000e+00 : f32
    %259 = vector.broadcast %cst_46 : f32 to vector<2x32xf32>
    %260 = arith.subf %259, %253 : vector<2x32xf32>
    %261 = arith.mulf %260, %258 : vector<2x32xf32>
    %262 = arith.mulf %253, %232 : vector<2x32xf32>
    %263 = arith.addf %261, %262 : vector<2x32xf32>
    %c0_47 = arith.constant 0 : index
    %c0_48 = arith.constant 0 : index
    %c0_49 = arith.constant 0 : index
    %264 = vector.load %arg16[%c0_47, %c0_48, %c0_49] : memref<2x2x32xf32, #tpu.memory_space<vmem>>, vector<1x2x32xf32>
    %265 = vector.shape_cast %264 : vector<1x2x32xf32> to vector<2x32xf32>
    %266 = vector.shape_cast %263 : vector<2x32xf32> to vector<1x2x32xf32>
    tpu.vector_store %arg16[%c0_47, %c0_48, %c0_49], %266 {strides = array<i32>} : memref<2x2x32xf32, #tpu.memory_space<vmem>>, vector<1x2x32xf32>,
    %267 = vector.extract_strided_slice %46 {offsets = [0, 0], sizes = [1, 32], strides = [1, 1]} : vector<2x32xf32> to vector<1x32xf32>
    %268 = vector.extract_strided_slice %77 {offsets = [0, 0], sizes = [1, 32], strides = [1, 1]} : vector<2x32xf32> to vector<1x32xf32>
    %269 = vector.extract_strided_slice %108 {offsets = [0, 0], sizes = [1, 32], strides = [1, 1]} : vector<2x32xf32> to vector<1x32xf32>
    %270 = vector.extract_strided_slice %139 {offsets = [0, 0], sizes = [1, 32], strides = [1, 1]} : vector<2x32xf32> to vector<1x32xf32>
    %271 = vector.extract_strided_slice %170 {offsets = [0, 0], sizes = [1, 32], strides = [1, 1]} : vector<2x32xf32> to vector<1x32xf32>
    %272 = vector.extract_strided_slice %201 {offsets = [0, 0], sizes = [1, 32], strides = [1, 1]} : vector<2x32xf32> to vector<1x32xf32>
    %273 = vector.extract_strided_slice %232 {offsets = [0, 0], sizes = [1, 32], strides = [1, 1]} : vector<2x32xf32> to vector<1x32xf32>
    %274 = vector.extract_strided_slice %263 {offsets = [0, 0], sizes = [1, 32], strides = [1, 1]} : vector<2x32xf32> to vector<1x32xf32>
    %275 = vector.extract_strided_slice %46 {offsets = [1, 0], sizes = [1, 32], strides = [1, 1]} : vector<2x32xf32> to vector<1x32xf32>
    %276 = vector.extract_strided_slice %77 {offsets = [1, 0], sizes = [1, 32], strides = [1, 1]} : vector<2x32xf32> to vector<1x32xf32>
    %277 = vector.extract_strided_slice %108 {offsets = [1, 0], sizes = [1, 32], strides = [1, 1]} : vector<2x32xf32> to vector<1x32xf32>
    %278 = vector.extract_strided_slice %139 {offsets = [1, 0], sizes = [1, 32], strides = [1, 1]} : vector<2x32xf32> to vector<1x32xf32>
    %279 = vector.extract_strided_slice %170 {offsets = [1, 0], sizes = [1, 32], strides = [1, 1]} : vector<2x32xf32> to vector<1x32xf32>
    %280 = vector.extract_strided_slice %201 {offsets = [1, 0], sizes = [1, 32], strides = [1, 1]} : vector<2x32xf32> to vector<1x32xf32>
    %281 = vector.extract_strided_slice %232 {offsets = [1, 0], sizes = [1, 32], strides = [1, 1]} : vector<2x32xf32> to vector<1x32xf32>
    %282 = vector.extract_strided_slice %263 {offsets = [1, 0], sizes = [1, 32], strides = [1, 1]} : vector<2x32xf32> to vector<1x32xf32>
    %283 = tpu.concatenate %267, %268, %269, %270, %271, %272, %273, %274, %275, %276, %277, %278, %279, %280, %281, %282 in 0 : vector<1x32xf32>, vector<1x32xf32>, vector<1x32xf32>, vector<1x32xf32>, vector<1x32xf32>, vector<1x32xf32>, vector<1x32xf32>, vector<1x32xf32>, vector<1x32xf32>, vector<1x32xf32>, vector<1x32xf32>, vector<1x32xf32>, vector<1x32xf32>, vector<1x32xf32>, vector<1x32xf32>, vector<1x32xf32> -> vector<16x32xf32>
    %c0_50 = arith.constant 0 : index
    %c0_51 = arith.constant 0 : index
    %284 = vector.load %arg7[%c0_50, %c0_51] : memref<32x96xf32, #tpu.memory_space<vmem>>, vector<32x96xf32>
    %c0_52 = arith.constant 0 : index
    %c0_53 = arith.constant 0 : index
    %285 = vector.load %arg8[%c0_52, %c0_53] : memref<32x96xf32, #tpu.memory_space<vmem>>, vector<32x96xf32>
    %c0_54 = arith.constant 0 : index
    %c0_55 = arith.constant 0 : index
    %286 = vector.load %arg9[%c0_54, %c0_55] : memref<1x96xf32, #tpu.memory_space<vmem>>, vector<1x96xf32>
    %c0_56 = arith.constant 0 : index
    %c0_57 = arith.constant 0 : index
    %287 = vector.load %arg10[%c0_56, %c0_57] : memref<1x96xf32, #tpu.memory_space<vmem>>, vector<1x96xf32>
    %cst_58 = arith.constant dense<0.000000e+00> : vector<16x96xf32>
    %288 = tpu.matmul %283, %284, %cst_58 {dimension_numbers = #tpu.dot_dimension_numbers<[1], [0], [0], [1], [0, 0, 1, 1], [], []>} : vector<16x32xf32>, vector<32x96xf32>, vector<16x96xf32> -> vector<16x96xf32>
    %289 = vector.broadcast %286 : vector<1x96xf32> to vector<16x96xf32>
    %290 = arith.addf %288, %289 : vector<16x96xf32>
    %291 = vector.shape_cast %287 : vector<1x96xf32> to vector<1x96xf32>
    %292 = vector.broadcast %291 : vector<1x96xf32> to vector<2x96xf32>
    %c1_59 = arith.constant 1 : index
    %c0_60 = arith.constant 0 : index
    %c0_61 = arith.constant 0 : index
    %293 = vector.load %arg2[%c1_59, %c0_60, %c0_61] : memref<2x2x32xf32, #tpu.memory_space<vmem>>, vector<1x2x32xf32>
    %294 = vector.shape_cast %293 : vector<1x2x32xf32> to vector<2x32xf32>
    %295 = vector.extract_strided_slice %290 {offsets = [0, 0], sizes = [1, 96], strides = [1, 1]} : vector<16x96xf32> to vector<1x96xf32>
    %296 = vector.extract_strided_slice %290 {offsets = [8, 0], sizes = [1, 96], strides = [1, 1]} : vector<16x96xf32> to vector<1x96xf32>
    %297 = tpu.concatenate %295, %296 in 0 : vector<1x96xf32>, vector<1x96xf32> -> vector<2x96xf32>
    %cst_62 = arith.constant dense<0.000000e+00> : vector<2x96xf32>
    %298 = tpu.matmul %294, %285, %cst_62 {dimension_numbers = #tpu.dot_dimension_numbers<[1], [0], [0], [1], [0, 0, 1, 1], [], []>} : vector<2x32xf32>, vector<32x96xf32>, vector<2x96xf32> -> vector<2x96xf32>
    %299 = arith.addf %298, %292 : vector<2x96xf32>
    %300 = vector.extract_strided_slice %297 {offsets = [0, 0], sizes = [2, 32], strides = [1, 1]} : vector<2x96xf32> to vector<2x32xf32>
    %301 = vector.extract_strided_slice %299 {offsets = [0, 0], sizes = [2, 32], strides = [1, 1]} : vector<2x96xf32> to vector<2x32xf32>
    %302 = arith.addf %300, %301 : vector<2x32xf32>
    %303 = arith.negf %302 : vector<2x32xf32>
    %304 = math.exp %303 : vector<2x32xf32>
    %cst_63 = arith.constant 1.000000e+00 : f32
    %305 = vector.broadcast %cst_63 : f32 to vector<2x32xf32>
    %306 = arith.addf %305, %304 : vector<2x32xf32>
    %307 = arith.divf %305, %306 : vector<2x32xf32>
    %308 = vector.extract_strided_slice %297 {offsets = [0, 32], sizes = [2, 32], strides = [1, 1]} : vector<2x96xf32> to vector<2x32xf32>
    %309 = vector.extract_strided_slice %299 {offsets = [0, 32], sizes = [2, 32], strides = [1, 1]} : vector<2x96xf32> to vector<2x32xf32>
    %310 = arith.addf %308, %309 : vector<2x32xf32>
    %311 = arith.negf %310 : vector<2x32xf32>
    %312 = math.exp %311 : vector<2x32xf32>
    %cst_64 = arith.constant 1.000000e+00 : f32
    %313 = vector.broadcast %cst_64 : f32 to vector<2x32xf32>
    %314 = arith.addf %313, %312 : vector<2x32xf32>
    %315 = arith.divf %313, %314 : vector<2x32xf32>
    %316 = vector.extract_strided_slice %297 {offsets = [0, 64], sizes = [2, 32], strides = [1, 1]} : vector<2x96xf32> to vector<2x32xf32>
    %317 = vector.extract_strided_slice %299 {offsets = [0, 64], sizes = [2, 32], strides = [1, 1]} : vector<2x96xf32> to vector<2x32xf32>
    %318 = arith.mulf %307, %317 : vector<2x32xf32>
    %319 = arith.addf %316, %318 : vector<2x32xf32>
    %320 = math.tanh %319 : vector<2x32xf32>
    %cst_65 = arith.constant 1.000000e+00 : f32
    %321 = vector.broadcast %cst_65 : f32 to vector<2x32xf32>
    %322 = arith.subf %321, %315 : vector<2x32xf32>
    %323 = arith.mulf %322, %320 : vector<2x32xf32>
    %324 = arith.mulf %315, %294 : vector<2x32xf32>
    %325 = arith.addf %323, %324 : vector<2x32xf32>
    %326 = vector.extract_strided_slice %290 {offsets = [1, 0], sizes = [1, 96], strides = [1, 1]} : vector<16x96xf32> to vector<1x96xf32>
    %327 = vector.extract_strided_slice %290 {offsets = [9, 0], sizes = [1, 96], strides = [1, 1]} : vector<16x96xf32> to vector<1x96xf32>
    %328 = tpu.concatenate %326, %327 in 0 : vector<1x96xf32>, vector<1x96xf32> -> vector<2x96xf32>
    %cst_66 = arith.constant dense<0.000000e+00> : vector<2x96xf32>
    %329 = tpu.matmul %325, %285, %cst_66 {dimension_numbers = #tpu.dot_dimension_numbers<[1], [0], [0], [1], [0, 0, 1, 1], [], []>} : vector<2x32xf32>, vector<32x96xf32>, vector<2x96xf32> -> vector<2x96xf32>
    %330 = arith.addf %329, %292 : vector<2x96xf32>
    %331 = vector.extract_strided_slice %328 {offsets = [0, 0], sizes = [2, 32], strides = [1, 1]} : vector<2x96xf32> to vector<2x32xf32>
    %332 = vector.extract_strided_slice %330 {offsets = [0, 0], sizes = [2, 32], strides = [1, 1]} : vector<2x96xf32> to vector<2x32xf32>
    %333 = arith.addf %331, %332 : vector<2x32xf32>
    %334 = arith.negf %333 : vector<2x32xf32>
    %335 = math.exp %334 : vector<2x32xf32>
    %cst_67 = arith.constant 1.000000e+00 : f32
    %336 = vector.broadcast %cst_67 : f32 to vector<2x32xf32>
    %337 = arith.addf %336, %335 : vector<2x32xf32>
    %338 = arith.divf %336, %337 : vector<2x32xf32>
    %339 = vector.extract_strided_slice %328 {offsets = [0, 32], sizes = [2, 32], strides = [1, 1]} : vector<2x96xf32> to vector<2x32xf32>
    %340 = vector.extract_strided_slice %330 {offsets = [0, 32], sizes = [2, 32], strides = [1, 1]} : vector<2x96xf32> to vector<2x32xf32>
    %341 = arith.addf %339, %340 : vector<2x32xf32>
    %342 = arith.negf %341 : vector<2x32xf32>
    %343 = math.exp %342 : vector<2x32xf32>
    %cst_68 = arith.constant 1.000000e+00 : f32
    %344 = vector.broadcast %cst_68 : f32 to vector<2x32xf32>
    %345 = arith.addf %344, %343 : vector<2x32xf32>
    %346 = arith.divf %344, %345 : vector<2x32xf32>
    %347 = vector.extract_strided_slice %328 {offsets = [0, 64], sizes = [2, 32], strides = [1, 1]} : vector<2x96xf32> to vector<2x32xf32>
    %348 = vector.extract_strided_slice %330 {offsets = [0, 64], sizes = [2, 32], strides = [1, 1]} : vector<2x96xf32> to vector<2x32xf32>
    %349 = arith.mulf %338, %348 : vector<2x32xf32>
    %350 = arith.addf %347, %349 : vector<2x32xf32>
    %351 = math.tanh %350 : vector<2x32xf32>
    %cst_69 = arith.constant 1.000000e+00 : f32
    %352 = vector.broadcast %cst_69 : f32 to vector<2x32xf32>
    %353 = arith.subf %352, %346 : vector<2x32xf32>
    %354 = arith.mulf %353, %351 : vector<2x32xf32>
    %355 = arith.mulf %346, %325 : vector<2x32xf32>
    %356 = arith.addf %354, %355 : vector<2x32xf32>
    %357 = vector.extract_strided_slice %290 {offsets = [2, 0], sizes = [1, 96], strides = [1, 1]} : vector<16x96xf32> to vector<1x96xf32>
    %358 = vector.extract_strided_slice %290 {offsets = [10, 0], sizes = [1, 96], strides = [1, 1]} : vector<16x96xf32> to vector<1x96xf32>
    %359 = tpu.concatenate %357, %358 in 0 : vector<1x96xf32>, vector<1x96xf32> -> vector<2x96xf32>
    %cst_70 = arith.constant dense<0.000000e+00> : vector<2x96xf32>
    %360 = tpu.matmul %356, %285, %cst_70 {dimension_numbers = #tpu.dot_dimension_numbers<[1], [0], [0], [1], [0, 0, 1, 1], [], []>} : vector<2x32xf32>, vector<32x96xf32>, vector<2x96xf32> -> vector<2x96xf32>
    %361 = arith.addf %360, %292 : vector<2x96xf32>
    %362 = vector.extract_strided_slice %359 {offsets = [0, 0], sizes = [2, 32], strides = [1, 1]} : vector<2x96xf32> to vector<2x32xf32>
    %363 = vector.extract_strided_slice %361 {offsets = [0, 0], sizes = [2, 32], strides = [1, 1]} : vector<2x96xf32> to vector<2x32xf32>
    %364 = arith.addf %362, %363 : vector<2x32xf32>
    %365 = arith.negf %364 : vector<2x32xf32>
    %366 = math.exp %365 : vector<2x32xf32>
    %cst_71 = arith.constant 1.000000e+00 : f32
    %367 = vector.broadcast %cst_71 : f32 to vector<2x32xf32>
    %368 = arith.addf %367, %366 : vector<2x32xf32>
    %369 = arith.divf %367, %368 : vector<2x32xf32>
    %370 = vector.extract_strided_slice %359 {offsets = [0, 32], sizes = [2, 32], strides = [1, 1]} : vector<2x96xf32> to vector<2x32xf32>
    %371 = vector.extract_strided_slice %361 {offsets = [0, 32], sizes = [2, 32], strides = [1, 1]} : vector<2x96xf32> to vector<2x32xf32>
    %372 = arith.addf %370, %371 : vector<2x32xf32>
    %373 = arith.negf %372 : vector<2x32xf32>
    %374 = math.exp %373 : vector<2x32xf32>
    %cst_72 = arith.constant 1.000000e+00 : f32
    %375 = vector.broadcast %cst_72 : f32 to vector<2x32xf32>
    %376 = arith.addf %375, %374 : vector<2x32xf32>
    %377 = arith.divf %375, %376 : vector<2x32xf32>
    %378 = vector.extract_strided_slice %359 {offsets = [0, 64], sizes = [2, 32], strides = [1, 1]} : vector<2x96xf32> to vector<2x32xf32>
    %379 = vector.extract_strided_slice %361 {offsets = [0, 64], sizes = [2, 32], strides = [1, 1]} : vector<2x96xf32> to vector<2x32xf32>
    %380 = arith.mulf %369, %379 : vector<2x32xf32>
    %381 = arith.addf %378, %380 : vector<2x32xf32>
    %382 = math.tanh %381 : vector<2x32xf32>
    %cst_73 = arith.constant 1.000000e+00 : f32
    %383 = vector.broadcast %cst_73 : f32 to vector<2x32xf32>
    %384 = arith.subf %383, %377 : vector<2x32xf32>
    %385 = arith.mulf %384, %382 : vector<2x32xf32>
    %386 = arith.mulf %377, %356 : vector<2x32xf32>
    %387 = arith.addf %385, %386 : vector<2x32xf32>
    %388 = vector.extract_strided_slice %290 {offsets = [3, 0], sizes = [1, 96], strides = [1, 1]} : vector<16x96xf32> to vector<1x96xf32>
    %389 = vector.extract_strided_slice %290 {offsets = [11, 0], sizes = [1, 96], strides = [1, 1]} : vector<16x96xf32> to vector<1x96xf32>
    %390 = tpu.concatenate %388, %389 in 0 : vector<1x96xf32>, vector<1x96xf32> -> vector<2x96xf32>
    %cst_74 = arith.constant dense<0.000000e+00> : vector<2x96xf32>
    %391 = tpu.matmul %387, %285, %cst_74 {dimension_numbers = #tpu.dot_dimension_numbers<[1], [0], [0], [1], [0, 0, 1, 1], [], []>} : vector<2x32xf32>, vector<32x96xf32>, vector<2x96xf32> -> vector<2x96xf32>
    %392 = arith.addf %391, %292 : vector<2x96xf32>
    %393 = vector.extract_strided_slice %390 {offsets = [0, 0], sizes = [2, 32], strides = [1, 1]} : vector<2x96xf32> to vector<2x32xf32>
    %394 = vector.extract_strided_slice %392 {offsets = [0, 0], sizes = [2, 32], strides = [1, 1]} : vector<2x96xf32> to vector<2x32xf32>
    %395 = arith.addf %393, %394 : vector<2x32xf32>
    %396 = arith.negf %395 : vector<2x32xf32>
    %397 = math.exp %396 : vector<2x32xf32>
    %cst_75 = arith.constant 1.000000e+00 : f32
    %398 = vector.broadcast %cst_75 : f32 to vector<2x32xf32>
    %399 = arith.addf %398, %397 : vector<2x32xf32>
    %400 = arith.divf %398, %399 : vector<2x32xf32>
    %401 = vector.extract_strided_slice %390 {offsets = [0, 32], sizes = [2, 32], strides = [1, 1]} : vector<2x96xf32> to vector<2x32xf32>
    %402 = vector.extract_strided_slice %392 {offsets = [0, 32], sizes = [2, 32], strides = [1, 1]} : vector<2x96xf32> to vector<2x32xf32>
    %403 = arith.addf %401, %402 : vector<2x32xf32>
    %404 = arith.negf %403 : vector<2x32xf32>
    %405 = math.exp %404 : vector<2x32xf32>
    %cst_76 = arith.constant 1.000000e+00 : f32
    %406 = vector.broadcast %cst_76 : f32 to vector<2x32xf32>
    %407 = arith.addf %406, %405 : vector<2x32xf32>
    %408 = arith.divf %406, %407 : vector<2x32xf32>
    %409 = vector.extract_strided_slice %390 {offsets = [0, 64], sizes = [2, 32], strides = [1, 1]} : vector<2x96xf32> to vector<2x32xf32>
    %410 = vector.extract_strided_slice %392 {offsets = [0, 64], sizes = [2, 32], strides = [1, 1]} : vector<2x96xf32> to vector<2x32xf32>
    %411 = arith.mulf %400, %410 : vector<2x32xf32>
    %412 = arith.addf %409, %411 : vector<2x32xf32>
    %413 = math.tanh %412 : vector<2x32xf32>
    %cst_77 = arith.constant 1.000000e+00 : f32
    %414 = vector.broadcast %cst_77 : f32 to vector<2x32xf32>
    %415 = arith.subf %414, %408 : vector<2x32xf32>
    %416 = arith.mulf %415, %413 : vector<2x32xf32>
    %417 = arith.mulf %408, %387 : vector<2x32xf32>
    %418 = arith.addf %416, %417 : vector<2x32xf32>
    %419 = vector.extract_strided_slice %290 {offsets = [4, 0], sizes = [1, 96], strides = [1, 1]} : vector<16x96xf32> to vector<1x96xf32>
    %420 = vector.extract_strided_slice %290 {offsets = [12, 0], sizes = [1, 96], strides = [1, 1]} : vector<16x96xf32> to vector<1x96xf32>
    %421 = tpu.concatenate %419, %420 in 0 : vector<1x96xf32>, vector<1x96xf32> -> vector<2x96xf32>
    %cst_78 = arith.constant dense<0.000000e+00> : vector<2x96xf32>
    %422 = tpu.matmul %418, %285, %cst_78 {dimension_numbers = #tpu.dot_dimension_numbers<[1], [0], [0], [1], [0, 0, 1, 1], [], []>} : vector<2x32xf32>, vector<32x96xf32>, vector<2x96xf32> -> vector<2x96xf32>
    %423 = arith.addf %422, %292 : vector<2x96xf32>
    %424 = vector.extract_strided_slice %421 {offsets = [0, 0], sizes = [2, 32], strides = [1, 1]} : vector<2x96xf32> to vector<2x32xf32>
    %425 = vector.extract_strided_slice %423 {offsets = [0, 0], sizes = [2, 32], strides = [1, 1]} : vector<2x96xf32> to vector<2x32xf32>
    %426 = arith.addf %424, %425 : vector<2x32xf32>
    %427 = arith.negf %426 : vector<2x32xf32>
    %428 = math.exp %427 : vector<2x32xf32>
    %cst_79 = arith.constant 1.000000e+00 : f32
    %429 = vector.broadcast %cst_79 : f32 to vector<2x32xf32>
    %430 = arith.addf %429, %428 : vector<2x32xf32>
    %431 = arith.divf %429, %430 : vector<2x32xf32>
    %432 = vector.extract_strided_slice %421 {offsets = [0, 32], sizes = [2, 32], strides = [1, 1]} : vector<2x96xf32> to vector<2x32xf32>
    %433 = vector.extract_strided_slice %423 {offsets = [0, 32], sizes = [2, 32], strides = [1, 1]} : vector<2x96xf32> to vector<2x32xf32>
    %434 = arith.addf %432, %433 : vector<2x32xf32>
    %435 = arith.negf %434 : vector<2x32xf32>
    %436 = math.exp %435 : vector<2x32xf32>
    %cst_80 = arith.constant 1.000000e+00 : f32
    %437 = vector.broadcast %cst_80 : f32 to vector<2x32xf32>
    %438 = arith.addf %437, %436 : vector<2x32xf32>
    %439 = arith.divf %437, %438 : vector<2x32xf32>
    %440 = vector.extract_strided_slice %421 {offsets = [0, 64], sizes = [2, 32], strides = [1, 1]} : vector<2x96xf32> to vector<2x32xf32>
    %441 = vector.extract_strided_slice %423 {offsets = [0, 64], sizes = [2, 32], strides = [1, 1]} : vector<2x96xf32> to vector<2x32xf32>
    %442 = arith.mulf %431, %441 : vector<2x32xf32>
    %443 = arith.addf %440, %442 : vector<2x32xf32>
    %444 = math.tanh %443 : vector<2x32xf32>
    %cst_81 = arith.constant 1.000000e+00 : f32
    %445 = vector.broadcast %cst_81 : f32 to vector<2x32xf32>
    %446 = arith.subf %445, %439 : vector<2x32xf32>
    %447 = arith.mulf %446, %444 : vector<2x32xf32>
    %448 = arith.mulf %439, %418 : vector<2x32xf32>
    %449 = arith.addf %447, %448 : vector<2x32xf32>
    %450 = vector.extract_strided_slice %290 {offsets = [5, 0], sizes = [1, 96], strides = [1, 1]} : vector<16x96xf32> to vector<1x96xf32>
    %451 = vector.extract_strided_slice %290 {offsets = [13, 0], sizes = [1, 96], strides = [1, 1]} : vector<16x96xf32> to vector<1x96xf32>
    %452 = tpu.concatenate %450, %451 in 0 : vector<1x96xf32>, vector<1x96xf32> -> vector<2x96xf32>
    %cst_82 = arith.constant dense<0.000000e+00> : vector<2x96xf32>
    %453 = tpu.matmul %449, %285, %cst_82 {dimension_numbers = #tpu.dot_dimension_numbers<[1], [0], [0], [1], [0, 0, 1, 1], [], []>} : vector<2x32xf32>, vector<32x96xf32>, vector<2x96xf32> -> vector<2x96xf32>
    %454 = arith.addf %453, %292 : vector<2x96xf32>
    %455 = vector.extract_strided_slice %452 {offsets = [0, 0], sizes = [2, 32], strides = [1, 1]} : vector<2x96xf32> to vector<2x32xf32>
    %456 = vector.extract_strided_slice %454 {offsets = [0, 0], sizes = [2, 32], strides = [1, 1]} : vector<2x96xf32> to vector<2x32xf32>
    %457 = arith.addf %455, %456 : vector<2x32xf32>
    %458 = arith.negf %457 : vector<2x32xf32>
    %459 = math.exp %458 : vector<2x32xf32>
    %cst_83 = arith.constant 1.000000e+00 : f32
    %460 = vector.broadcast %cst_83 : f32 to vector<2x32xf32>
    %461 = arith.addf %460, %459 : vector<2x32xf32>
    %462 = arith.divf %460, %461 : vector<2x32xf32>
    %463 = vector.extract_strided_slice %452 {offsets = [0, 32], sizes = [2, 32], strides = [1, 1]} : vector<2x96xf32> to vector<2x32xf32>
    %464 = vector.extract_strided_slice %454 {offsets = [0, 32], sizes = [2, 32], strides = [1, 1]} : vector<2x96xf32> to vector<2x32xf32>
    %465 = arith.addf %463, %464 : vector<2x32xf32>
    %466 = arith.negf %465 : vector<2x32xf32>
    %467 = math.exp %466 : vector<2x32xf32>
    %cst_84 = arith.constant 1.000000e+00 : f32
    %468 = vector.broadcast %cst_84 : f32 to vector<2x32xf32>
    %469 = arith.addf %468, %467 : vector<2x32xf32>
    %470 = arith.divf %468, %469 : vector<2x32xf32>
    %471 = vector.extract_strided_slice %452 {offsets = [0, 64], sizes = [2, 32], strides = [1, 1]} : vector<2x96xf32> to vector<2x32xf32>
    %472 = vector.extract_strided_slice %454 {offsets = [0, 64], sizes = [2, 32], strides = [1, 1]} : vector<2x96xf32> to vector<2x32xf32>
    %473 = arith.mulf %462, %472 : vector<2x32xf32>
    %474 = arith.addf %471, %473 : vector<2x32xf32>
    %475 = math.tanh %474 : vector<2x32xf32>
    %cst_85 = arith.constant 1.000000e+00 : f32
    %476 = vector.broadcast %cst_85 : f32 to vector<2x32xf32>
    %477 = arith.subf %476, %470 : vector<2x32xf32>
    %478 = arith.mulf %477, %475 : vector<2x32xf32>
    %479 = arith.mulf %470, %449 : vector<2x32xf32>
    %480 = arith.addf %478, %479 : vector<2x32xf32>
    %481 = vector.extract_strided_slice %290 {offsets = [6, 0], sizes = [1, 96], strides = [1, 1]} : vector<16x96xf32> to vector<1x96xf32>
    %482 = vector.extract_strided_slice %290 {offsets = [14, 0], sizes = [1, 96], strides = [1, 1]} : vector<16x96xf32> to vector<1x96xf32>
    %483 = tpu.concatenate %481, %482 in 0 : vector<1x96xf32>, vector<1x96xf32> -> vector<2x96xf32>
    %cst_86 = arith.constant dense<0.000000e+00> : vector<2x96xf32>
    %484 = tpu.matmul %480, %285, %cst_86 {dimension_numbers = #tpu.dot_dimension_numbers<[1], [0], [0], [1], [0, 0, 1, 1], [], []>} : vector<2x32xf32>, vector<32x96xf32>, vector<2x96xf32> -> vector<2x96xf32>
    %485 = arith.addf %484, %292 : vector<2x96xf32>
    %486 = vector.extract_strided_slice %483 {offsets = [0, 0], sizes = [2, 32], strides = [1, 1]} : vector<2x96xf32> to vector<2x32xf32>
    %487 = vector.extract_strided_slice %485 {offsets = [0, 0], sizes = [2, 32], strides = [1, 1]} : vector<2x96xf32> to vector<2x32xf32>
    %488 = arith.addf %486, %487 : vector<2x32xf32>
    %489 = arith.negf %488 : vector<2x32xf32>
    %490 = math.exp %489 : vector<2x32xf32>
    %cst_87 = arith.constant 1.000000e+00 : f32
    %491 = vector.broadcast %cst_87 : f32 to vector<2x32xf32>
    %492 = arith.addf %491, %490 : vector<2x32xf32>
    %493 = arith.divf %491, %492 : vector<2x32xf32>
    %494 = vector.extract_strided_slice %483 {offsets = [0, 32], sizes = [2, 32], strides = [1, 1]} : vector<2x96xf32> to vector<2x32xf32>
    %495 = vector.extract_strided_slice %485 {offsets = [0, 32], sizes = [2, 32], strides = [1, 1]} : vector<2x96xf32> to vector<2x32xf32>
    %496 = arith.addf %494, %495 : vector<2x32xf32>
    %497 = arith.negf %496 : vector<2x32xf32>
    %498 = math.exp %497 : vector<2x32xf32>
    %cst_88 = arith.constant 1.000000e+00 : f32
    %499 = vector.broadcast %cst_88 : f32 to vector<2x32xf32>
    %500 = arith.addf %499, %498 : vector<2x32xf32>
    %501 = arith.divf %499, %500 : vector<2x32xf32>
    %502 = vector.extract_strided_slice %483 {offsets = [0, 64], sizes = [2, 32], strides = [1, 1]} : vector<2x96xf32> to vector<2x32xf32>
    %503 = vector.extract_strided_slice %485 {offsets = [0, 64], sizes = [2, 32], strides = [1, 1]} : vector<2x96xf32> to vector<2x32xf32>
    %504 = arith.mulf %493, %503 : vector<2x32xf32>
    %505 = arith.addf %502, %504 : vector<2x32xf32>
    %506 = math.tanh %505 : vector<2x32xf32>
    %cst_89 = arith.constant 1.000000e+00 : f32
    %507 = vector.broadcast %cst_89 : f32 to vector<2x32xf32>
    %508 = arith.subf %507, %501 : vector<2x32xf32>
    %509 = arith.mulf %508, %506 : vector<2x32xf32>
    %510 = arith.mulf %501, %480 : vector<2x32xf32>
    %511 = arith.addf %509, %510 : vector<2x32xf32>
    %512 = vector.extract_strided_slice %290 {offsets = [7, 0], sizes = [1, 96], strides = [1, 1]} : vector<16x96xf32> to vector<1x96xf32>
    %513 = vector.extract_strided_slice %290 {offsets = [15, 0], sizes = [1, 96], strides = [1, 1]} : vector<16x96xf32> to vector<1x96xf32>
    %514 = tpu.concatenate %512, %513 in 0 : vector<1x96xf32>, vector<1x96xf32> -> vector<2x96xf32>
    %cst_90 = arith.constant dense<0.000000e+00> : vector<2x96xf32>
    %515 = tpu.matmul %511, %285, %cst_90 {dimension_numbers = #tpu.dot_dimension_numbers<[1], [0], [0], [1], [0, 0, 1, 1], [], []>} : vector<2x32xf32>, vector<32x96xf32>, vector<2x96xf32> -> vector<2x96xf32>
    %516 = arith.addf %515, %292 : vector<2x96xf32>
    %517 = vector.extract_strided_slice %514 {offsets = [0, 0], sizes = [2, 32], strides = [1, 1]} : vector<2x96xf32> to vector<2x32xf32>
    %518 = vector.extract_strided_slice %516 {offsets = [0, 0], sizes = [2, 32], strides = [1, 1]} : vector<2x96xf32> to vector<2x32xf32>
    %519 = arith.addf %517, %518 : vector<2x32xf32>
    %520 = arith.negf %519 : vector<2x32xf32>
    %521 = math.exp %520 : vector<2x32xf32>
    %cst_91 = arith.constant 1.000000e+00 : f32
    %522 = vector.broadcast %cst_91 : f32 to vector<2x32xf32>
    %523 = arith.addf %522, %521 : vector<2x32xf32>
    %524 = arith.divf %522, %523 : vector<2x32xf32>
    %525 = vector.extract_strided_slice %514 {offsets = [0, 32], sizes = [2, 32], strides = [1, 1]} : vector<2x96xf32> to vector<2x32xf32>
    %526 = vector.extract_strided_slice %516 {offsets = [0, 32], sizes = [2, 32], strides = [1, 1]} : vector<2x96xf32> to vector<2x32xf32>
    %527 = arith.addf %525, %526 : vector<2x32xf32>
    %528 = arith.negf %527 : vector<2x32xf32>
    %529 = math.exp %528 : vector<2x32xf32>
    %cst_92 = arith.constant 1.000000e+00 : f32
    %530 = vector.broadcast %cst_92 : f32 to vector<2x32xf32>
    %531 = arith.addf %530, %529 : vector<2x32xf32>
    %532 = arith.divf %530, %531 : vector<2x32xf32>
    %533 = vector.extract_strided_slice %514 {offsets = [0, 64], sizes = [2, 32], strides = [1, 1]} : vector<2x96xf32> to vector<2x32xf32>
    %534 = vector.extract_strided_slice %516 {offsets = [0, 64], sizes = [2, 32], strides = [1, 1]} : vector<2x96xf32> to vector<2x32xf32>
    %535 = arith.mulf %524, %534 : vector<2x32xf32>
    %536 = arith.addf %533, %535 : vector<2x32xf32>
    %537 = math.tanh %536 : vector<2x32xf32>
    %cst_93 = arith.constant 1.000000e+00 : f32
    %538 = vector.broadcast %cst_93 : f32 to vector<2x32xf32>
    %539 = arith.subf %538, %532 : vector<2x32xf32>
    %540 = arith.mulf %539, %537 : vector<2x32xf32>
    %541 = arith.mulf %532, %511 : vector<2x32xf32>
    %542 = arith.addf %540, %541 : vector<2x32xf32>
    %c1_94 = arith.constant 1 : index
    %c0_95 = arith.constant 0 : index
    %c0_96 = arith.constant 0 : index
    %543 = vector.load %arg16[%c1_94, %c0_95, %c0_96] : memref<2x2x32xf32, #tpu.memory_space<vmem>>, vector<1x2x32xf32>
    %544 = vector.shape_cast %543 : vector<1x2x32xf32> to vector<2x32xf32>
    %545 = vector.shape_cast %542 : vector<2x32xf32> to vector<1x2x32xf32>
    tpu.vector_store %arg16[%c1_94, %c0_95, %c0_96], %545 {strides = array<i32>} : memref<2x2x32xf32, #tpu.memory_space<vmem>>, vector<1x2x32xf32>,
    %546 = vector.extract_strided_slice %325 {offsets = [0, 0], sizes = [1, 32], strides = [1, 1]} : vector<2x32xf32> to vector<1x32xf32>
    %547 = vector.extract_strided_slice %356 {offsets = [0, 0], sizes = [1, 32], strides = [1, 1]} : vector<2x32xf32> to vector<1x32xf32>
    %548 = vector.extract_strided_slice %387 {offsets = [0, 0], sizes = [1, 32], strides = [1, 1]} : vector<2x32xf32> to vector<1x32xf32>
    %549 = vector.extract_strided_slice %418 {offsets = [0, 0], sizes = [1, 32], strides = [1, 1]} : vector<2x32xf32> to vector<1x32xf32>
    %550 = vector.extract_strided_slice %449 {offsets = [0, 0], sizes = [1, 32], strides = [1, 1]} : vector<2x32xf32> to vector<1x32xf32>
    %551 = vector.extract_strided_slice %480 {offsets = [0, 0], sizes = [1, 32], strides = [1, 1]} : vector<2x32xf32> to vector<1x32xf32>
    %552 = vector.extract_strided_slice %511 {offsets = [0, 0], sizes = [1, 32], strides = [1, 1]} : vector<2x32xf32> to vector<1x32xf32>
    %553 = vector.extract_strided_slice %542 {offsets = [0, 0], sizes = [1, 32], strides = [1, 1]} : vector<2x32xf32> to vector<1x32xf32>
    %554 = vector.extract_strided_slice %325 {offsets = [1, 0], sizes = [1, 32], strides = [1, 1]} : vector<2x32xf32> to vector<1x32xf32>
    %555 = vector.extract_strided_slice %356 {offsets = [1, 0], sizes = [1, 32], strides = [1, 1]} : vector<2x32xf32> to vector<1x32xf32>
    %556 = vector.extract_strided_slice %387 {offsets = [1, 0], sizes = [1, 32], strides = [1, 1]} : vector<2x32xf32> to vector<1x32xf32>
    %557 = vector.extract_strided_slice %418 {offsets = [1, 0], sizes = [1, 32], strides = [1, 1]} : vector<2x32xf32> to vector<1x32xf32>
    %558 = vector.extract_strided_slice %449 {offsets = [1, 0], sizes = [1, 32], strides = [1, 1]} : vector<2x32xf32> to vector<1x32xf32>
    %559 = vector.extract_strided_slice %480 {offsets = [1, 0], sizes = [1, 32], strides = [1, 1]} : vector<2x32xf32> to vector<1x32xf32>
    %560 = vector.extract_strided_slice %511 {offsets = [1, 0], sizes = [1, 32], strides = [1, 1]} : vector<2x32xf32> to vector<1x32xf32>
    %561 = vector.extract_strided_slice %542 {offsets = [1, 0], sizes = [1, 32], strides = [1, 1]} : vector<2x32xf32> to vector<1x32xf32>
    %562 = tpu.concatenate %546, %547, %548, %549, %550, %551, %552, %553, %554, %555, %556, %557, %558, %559, %560, %561 in 0 : vector<1x32xf32>, vector<1x32xf32>, vector<1x32xf32>, vector<1x32xf32>, vector<1x32xf32>, vector<1x32xf32>, vector<1x32xf32>, vector<1x32xf32>, vector<1x32xf32>, vector<1x32xf32>, vector<1x32xf32>, vector<1x32xf32>, vector<1x32xf32>, vector<1x32xf32>, vector<1x32xf32>, vector<1x32xf32> -> vector<16x32xf32>
    %c0_97 = arith.constant 0 : index
    %c0_98 = arith.constant 0 : index
    %563 = vector.load %arg11[%c0_97, %c0_98] : memref<32x32xf32, #tpu.memory_space<vmem>>, vector<32x32xf32>
    %cst_99 = arith.constant dense<0.000000e+00> : vector<16x32xf32>
    %564 = tpu.matmul %562, %563, %cst_99 {dimension_numbers = #tpu.dot_dimension_numbers<[1], [0], [0], [1], [0, 0, 1, 1], [], []>} : vector<16x32xf32>, vector<32x32xf32>, vector<16x32xf32> -> vector<16x32xf32>
    %c0_100 = arith.constant 0 : index
    %c0_101 = arith.constant 0 : index
    %565 = vector.load %arg12[%c0_100, %c0_101] : memref<1x32xf32, #tpu.memory_space<vmem>>, vector<1x32xf32>
    %566 = vector.broadcast %565 : vector<1x32xf32> to vector<16x32xf32>
    %567 = arith.addf %564, %566 : vector<16x32xf32>
    %cst_102 = arith.constant 0.000000e+00 : f32
    %568 = vector.broadcast %cst_102 : f32 to vector<16x32xf32>
    %569 = arith.maximumf %567, %568 : vector<16x32xf32>
    %c0_103 = arith.constant 0 : index
    %c0_104 = arith.constant 0 : index
    %570 = vector.load %arg13[%c0_103, %c0_104] : memref<32x8xf32, #tpu.memory_space<vmem>>, vector<32x8xf32>
    %cst_105 = arith.constant dense<0.000000e+00> : vector<16x8xf32>
    %571 = tpu.matmul %569, %570, %cst_105 {dimension_numbers = #tpu.dot_dimension_numbers<[1], [0], [0], [1], [0, 0, 1, 1], [], []>} : vector<16x32xf32>, vector<32x8xf32>, vector<16x8xf32> -> vector<16x8xf32>
    %c0_106 = arith.constant 0 : index
    %c0_107 = arith.constant 0 : index
    %572 = vector.load %arg14[%c0_106, %c0_107] : memref<1x8xf32, #tpu.memory_space<vmem>>, vector<1x8xf32>
    %573 = vector.broadcast %572 : vector<1x8xf32> to vector<16x8xf32>
    %574 = arith.addf %571, %573 : vector<16x8xf32>
    %575 = arith.negf %574 : vector<16x8xf32>
    %576 = math.exp %575 : vector<16x8xf32>
    %cst_108 = arith.constant 1.000000e+00 : f32
    %577 = vector.broadcast %cst_108 : f32 to vector<16x8xf32>
    %578 = arith.addf %577, %576 : vector<16x8xf32>
    %579 = arith.divf %577, %578 : vector<16x8xf32>
    %580 = vector.extract_strided_slice %579 {offsets = [0, 0], sizes = [8, 8], strides = [1, 1]} : vector<16x8xf32> to vector<8x8xf32>
    %c0_109 = arith.constant 0 : index
    %c0_110 = arith.constant 0 : index
    %c0_111 = arith.constant 0 : index
    %581 = vector.load %arg15[%c0_109, %c0_110, %c0_111] : memref<2x8x8xf32, #tpu.memory_space<vmem>>, vector<1x8x8xf32>
    %582 = vector.shape_cast %581 : vector<1x8x8xf32> to vector<8x8xf32>
    %583 = vector.shape_cast %580 : vector<8x8xf32> to vector<1x8x8xf32>
    tpu.vector_store %arg15[%c0_109, %c0_110, %c0_111], %583 {strides = array<i32>} : memref<2x8x8xf32, #tpu.memory_space<vmem>>, vector<1x8x8xf32>,
    %584 = vector.extract_strided_slice %579 {offsets = [8, 0], sizes = [8, 8], strides = [1, 1]} : vector<16x8xf32> to vector<8x8xf32>
    %c1_112 = arith.constant 1 : index
    %c0_113 = arith.constant 0 : index
    %c0_114 = arith.constant 0 : index
    %585 = vector.load %arg15[%c1_112, %c0_113, %c0_114] : memref<2x8x8xf32, #tpu.memory_space<vmem>>, vector<1x8x8xf32>
    %586 = vector.shape_cast %585 : vector<1x8x8xf32> to vector<8x8xf32>
    %587 = vector.shape_cast %584 : vector<8x8xf32> to vector<1x8x8xf32>
    tpu.vector_store %arg15[%c1_112, %c0_113, %c0_114], %587 {strides = array<i32>} : memref<2x8x8xf32, #tpu.memory_space<vmem>>, vector<1x8x8xf32>,
    return
  }
  func.func @transform_0(%arg0: i32) -> (i32, i32, i32) {
    %c0_i32 = arith.constant 0 : i32
    %c0_i32_0 = arith.constant 0 : i32
    %c0_i32_1 = arith.constant 0 : i32
    %c0_i32_2 = arith.constant 0 : i32
    return %c0_i32, %c0_i32_0, %c0_i32_1 : i32, i32, i32
  }
  func.func @transform_1(%arg0: i32) -> (i32, i32, i32) {
    %c0_i32 = arith.constant 0 : i32
    %c0_i32_0 = arith.constant 0 : i32
    %c0_i32_1 = arith.constant 0 : i32
    %c0_i32_2 = arith.constant 0 : i32
    return %c0_i32, %c0_i32_0, %c0_i32_1 : i32, i32, i32
  }
  func.func @transform_2(%arg0: i32) -> (i32, i32) {
    %c0_i32 = arith.constant 0 : i32
    %c0_i32_0 = arith.constant 0 : i32
    %c0_i32_1 = arith.constant 0 : i32
    return %c0_i32, %c0_i32_0 : i32, i32
  }
  func.func @transform_3(%arg0: i32) -> (i32, i32) {
    %c0_i32 = arith.constant 0 : i32
    %c0_i32_0 = arith.constant 0 : i32
    %c0_i32_1 = arith.constant 0 : i32
    return %c0_i32, %c0_i32_0 : i32, i32
  }
  func.func @transform_4(%arg0: i32) -> (i32, i32) {
    %c0_i32 = arith.constant 0 : i32
    %c0_i32_0 = arith.constant 0 : i32
    %c0_i32_1 = arith.constant 0 : i32
    return %c0_i32, %c0_i32_0 : i32, i32
  }
  func.func @transform_5(%arg0: i32) -> (i32, i32) {
    %c0_i32 = arith.constant 0 : i32
    %c0_i32_0 = arith.constant 0 : i32
    %c0_i32_1 = arith.constant 0 : i32
    return %c0_i32, %c0_i32_0 : i32, i32
  }
  func.func @transform_6(%arg0: i32) -> (i32, i32) {
    %c0_i32 = arith.constant 0 : i32
    %c0_i32_0 = arith.constant 0 : i32
    %c0_i32_1 = arith.constant 0 : i32
    return %c0_i32, %c0_i32_0 : i32, i32
  }
  func.func @transform_7(%arg0: i32) -> (i32, i32) {
    %c0_i32 = arith.constant 0 : i32
    %c0_i32_0 = arith.constant 0 : i32
    %c0_i32_1 = arith.constant 0 : i32
    return %c0_i32, %c0_i32_0 : i32, i32
  }
  func.func @transform_8(%arg0: i32) -> (i32, i32) {
    %c0_i32 = arith.constant 0 : i32
    %c0_i32_0 = arith.constant 0 : i32
    %c0_i32_1 = arith.constant 0 : i32
    return %c0_i32, %c0_i32_0 : i32, i32
  }
  func.func @transform_9(%arg0: i32) -> (i32, i32) {
    %c0_i32 = arith.constant 0 : i32
    %c0_i32_0 = arith.constant 0 : i32
    %c0_i32_1 = arith.constant 0 : i32
    return %c0_i32, %c0_i32_0 : i32, i32
  }
  func.func @transform_10(%arg0: i32) -> (i32, i32) {
    %c0_i32 = arith.constant 0 : i32
    %c0_i32_0 = arith.constant 0 : i32
    %c0_i32_1 = arith.constant 0 : i32
    return %c0_i32, %c0_i32_0 : i32, i32
  }
  func.func @transform_11(%arg0: i32) -> (i32, i32) {
    %c0_i32 = arith.constant 0 : i32
    %c0_i32_0 = arith.constant 0 : i32
    %c0_i32_1 = arith.constant 0 : i32
    return %c0_i32, %c0_i32_0 : i32, i32
  }
  func.func @transform_12(%arg0: i32) -> (i32, i32) {
    %c0_i32 = arith.constant 0 : i32
    %c0_i32_0 = arith.constant 0 : i32
    %c0_i32_1 = arith.constant 0 : i32
    return %c0_i32, %c0_i32_0 : i32, i32
  }
  func.func @transform_13(%arg0: i32) -> (i32, i32) {
    %c0_i32 = arith.constant 0 : i32
    %c0_i32_0 = arith.constant 0 : i32
    %c0_i32_1 = arith.constant 0 : i32
    return %c0_i32, %c0_i32_0 : i32, i32
  }
  func.func @transform_14(%arg0: i32) -> (i32, i32, i32) {
    %c0_i32 = arith.constant 0 : i32
    %c0_i32_0 = arith.constant 0 : i32
    %c0_i32_1 = arith.constant 0 : i32
    %c0_i32_2 = arith.constant 0 : i32
    return %c0_i32, %c0_i32_0, %c0_i32_1 : i32, i32, i32
  }
  func.func @transform_15(%arg0: i32) -> (i32, i32, i32) {
    %c0_i32 = arith.constant 0 : i32
    %c0_i32_0 = arith.constant 0 : i32
    %c0_i32_1 = arith.constant 0 : i32
    %c0_i32_2 = arith.constant 0 : i32
    return %c0_i32, %c0_i32_0, %c0_i32_1 : i32, i32, i32
  }
}

</mosaic_0001>

<bundles_post_ra>
// kernel: rnn_dnn_forward.1
= control target key start
LH: loop header
LB: loop body
LE: loop exit
PB: predicated region body
PF: predicated region fallthrough
CT: control target
= control target key end

     0   :  { %21 = vsyncpa [#allocation3], 0  ;;  %s3953_s0 = inlined_call_operand.vmem [shape: f32[2,8,16], index: 0, kind: input, shape index: {}]   ;;  %s3954_s1 = inlined_call_operand.vmem [shape: f32[2,2,32], index: 1, kind: input, shape index: {}]   ;;  %s3955_s2 = inlined_call_operand.hbm [shape: f32[16,96], index: 2, kind: input, shape index: {}]   ;;  %s3956_s3 = inlined_call_operand.vmem [shape: f32[32,96], index: 3, kind: input, shape index: {}]   ;;  %s3957_s4 = inlined_call_operand.vmem [shape: f32[1,96], index: 4, kind: input, shape index: {}]   ;;  %s3958_s5 = inlined_call_operand.hbm [shape: f32[1,96], index: 5, kind: input, shape index: {}]   ;;  %s3959_s6 = inlined_call_operand.vmem [shape: f32[32,96], index: 6, kind: input, shape index: {}]   ;;  %s3960_s7 = inlined_call_operand.hbm [shape: f32[32,96], index: 7, kind: input, shape index: {}]   ;;  %s3961_s8 = inlined_call_operand.hbm [shape: f32[1,96], index: 8, kind: input, shape index: {}]   ;;  %s3962_s9 = inlined_call_operand.hbm [shape: f32[1,96], index: 9, kind: input, shape index: {}]   ;;  %s3963_s10 = inlined_call_operand.hbm [shape: f32[32,32], index: 10, kind: input, shape index: {}]   ;;  %s3964_s11 = inlined_call_operand.hbm [shape: f32[1,32], index: 11, kind: input, shape index: {}]   ;;  %s3965_s12 = inlined_call_operand.vmem [shape: f32[32,8], index: 12, kind: input, shape index: {}]   ;;  %s3966_s13 = inlined_call_operand.hbm [shape: f32[1,8], index: 13, kind: input, shape index: {}]   ;;  %s3967_s14 = inlined_call_operand.hbm [shape: f32[2,8,8], index: 14, kind: output, shape index: {0}]   ;;  %s3968_s15 = inlined_call_operand.hbm [shape: f32[2,2,32], index: 15, kind: output, shape index: {1}]  }
   0x1   :  { %22 = vsyncpa [#allocation6], 0 }
   0x2   :  { %23 = vsyncpa [#allocation9], 0 }
   0x3   :  { %24 = vsyncpa [#allocation12], 0 }
   0x4   :  { %25 = vsyncpa [#allocation15], 0 }
   0x5   :  { %26 = vsyncpa [#allocation4], 0 }
   0x6   :  { %27 = vsyncpa [#allocation18], 0  ;;  %s3255_s18 = smov [#allocation5]   ;;  %s3256_s20 = smov [#allocation8]  }
   0x7   :  { %s54_s19 = sshll.u32 %s3255_s18, 4  ;;  %s78_s21 = sshll.u32 %s3256_s20, 4  ;;  %s55_s19 = int_to_ptr.vmem [resolvable:$true] %s54_s19  ;;  %s79_s21 = int_to_ptr.vmem [resolvable:$true] %s78_s21 }
   0x8   :  { %s3021_s24 = scalar_lea.hbm %s3958_s5, 16 }
   0x9   :  { %p3022_p0 = scmp.ne.s32.totalorder %s3958_s5, %s3021_s24  ;;  %p3025_p1 = scmp.lt.u32.totalorder %s3021_s24, %s3958_s5 }
   0xb   :  { %p3027_p2 = pnand %p3025_p1, %p3022_p0 }
   0xd   :  { %3030 = shalt.err (!%p3027_p2)
}
   0xe   :  { %s3031_s29 = scalar_lea.vmem %s55_s19, 16  ;;  %s3035_s30 = scalar_lea.vmem %s55_s19, 32 }
   0xf   :  { %p3032_p3 = scmp.ne.s32.totalorder %s55_s19, %s3031_s29  ;;  %p3036_p4 = scmp.lt.s32.totalorder %s55_s19, %s55_s19 }
  0x10   :  { %p3037_p5 = scmp.lt.s32.totalorder %s3035_s30, %s3031_s29 }
  0x12   :  { %p3038_p6 = por %p3037_p5, %p3036_p4 }
  0x14   :  { %p3039_p7 = pnand %p3038_p6, %p3032_p3 }
  0x16   :  { %3042 = shalt.err (!%p3039_p7)
}
  0x17   :  { %57 = dma.hbm_to_vmem [thread:$0]  %s3958_s5, 16, %s55_s19, [#allocation6]  }
  0x18   :  { %s3043_s22 = scalar_lea.hbm %s3961_s8, 16 }
  0x19   :  { %p3044_p8 = scmp.ne.s32.totalorder %s3961_s8, %s3043_s22  ;;  %p3047_p9 = scmp.lt.u32.totalorder %s3043_s22, %s3961_s8 }
  0x1b   :  { %p3049_p10 = pnand %p3047_p9, %p3044_p8 }
  0x1d   :  { %3052 = shalt.err (!%p3049_p10)
}
  0x1e   :  { %s3053_s27 = scalar_lea.vmem %s79_s21, 16  ;;  %s3057_s28 = scalar_lea.vmem %s79_s21, 32 }
  0x1f   :  { %p3054_p11 = scmp.ne.s32.totalorder %s79_s21, %s3053_s27  ;;  %p3058_p12 = scmp.lt.s32.totalorder %s79_s21, %s79_s21 }
  0x20   :  { %p3059_p13 = scmp.lt.s32.totalorder %s3057_s28, %s3053_s27 }
  0x22   :  { %p3060_p0 = por %p3059_p13, %p3058_p12 }
  0x24   :  { %p3061_p1 = pnand %p3060_p0, %p3054_p11 }
  0x26   :  { %3064 = shalt.err (!%p3061_p1)
}
  0x27   :  { %81 = dma.hbm_to_vmem [thread:$0]  %s3961_s8, 16, %s79_s21, [#allocation9]  }
  0x28   :  { %s3257_s29 = smov [#allocation11]   ;;  %s3258_s16 = smov [#allocation2]  }
  0x29   :  { %s97_s30 = sshll.u32 %s3257_s29, 4  ;;  %s37_s17 = sshll.u32 %s3258_s16, 4  ;;  %s98_s30 = int_to_ptr.vmem [resolvable:$true] %s97_s30  ;;  %s3378_s17 = int_to_ptr.vmem [resolvable:$true] %s37_s17 }
  0x2a   :  { %s3065_s22 = scalar_lea.hbm %s3963_s10, 512 }
  0x2b   :  { %p3066_p2 = scmp.ne.s32.totalorder %s3963_s10, %s3065_s22  ;;  %p3069_p3 = scmp.lt.u32.totalorder %s3065_s22, %s3963_s10 }
  0x2d   :  { %p3071_p4 = pnand %p3069_p3, %p3066_p2 }
  0x2f   :  { %3074 = shalt.err (!%p3071_p4)
}
  0x30   :  { %s3075_s8 = scalar_lea.vmem %s98_s30, 512  ;;  %p3080_p6 = scmp.lt.s32.totalorder %s98_s30, %s98_s30 }
  0x31   :  { %p3076_p5 = scmp.ne.s32.totalorder %s98_s30, %s3075_s8  ;;  %p3081_p7 = scmp.lt.s32.totalorder %s3075_s8, %s3075_s8 }
  0x33   :  { %p3082_p8 = por %p3081_p7, %p3080_p6 }
  0x35   :  { %p3083_p9 = pnand %p3082_p8, %p3076_p5 }
  0x37   :  { %3086 = shalt.err (!%p3083_p9)
}
  0x38   :  { %s3259_s21 = smov 128   ;;  %s3260_s27 = smov 8  }
  0x39   :  { %103 = dma.hbm_to_vmem [thread:$0]  %s3963_s10, 512, %s98_s30, [#allocation12], %s3259_s21, %s3259_s21, %s3260_s27  }
  0x3a   :  { %s3087_s16 = scalar_lea.hbm %s3955_s2, 256 }
  0x3b   :  { %p3088_p10 = scmp.ne.s32.totalorder %s3955_s2, %s3087_s16  ;;  %p3091_p11 = scmp.lt.u32.totalorder %s3087_s16, %s3955_s2 }
  0x3d   :  { %p3093_p12 = pnand %p3091_p11, %p3088_p10 }
  0x3f   :  { %3096 = shalt.err (!%p3093_p12)
}
  0x40   :  { %s3097_s24 = scalar_lea.vmem %s3378_s17, 256  ;;  %p3102_p0 = scmp.lt.s32.totalorder %s3378_s17, %s3378_s17 }
  0x41   :  { %p3098_p13 = scmp.ne.s32.totalorder %s3378_s17, %s3097_s24  ;;  %p3103_p1 = scmp.lt.s32.totalorder %s3097_s24, %s3097_s24 }
  0x43   :  { %p3104_p2 = por %p3103_p1, %p3102_p0 }
  0x45   :  { %p3105_p3 = pnand %p3104_p2, %p3098_p13 }
  0x47   :  { %3108 = shalt.err (!%p3105_p3)
}
  0x48   :  { %43 = dma.hbm_to_vmem [thread:$0]  %s3955_s2, 256, %s3378_s17, [#allocation3], %s3259_s21, %s3259_s21, %s3260_s27  }
  0x49   :  { %s3261_s25 = smov [#allocation7]   ;;  %s3262_s8 = smov [#allocation10]  }
  0x4a   :  { %s65_s26 = sshll.u32 %s3261_s25, 4  ;;  %s88_s28 = sshll.u32 %s3262_s8, 4  ;;  %s66_s26 = int_to_ptr.vmem [resolvable:$true] %s65_s26  ;;  %s89_s28 = int_to_ptr.vmem [resolvable:$true] %s88_s28 }
  0x4b   :  { %s3109_s29 = scalar_lea.hbm %s3960_s7, 512 }
  0x4c   :  { %p3110_p4 = scmp.ne.s32.totalorder %s3960_s7, %s3109_s29  ;;  %p3113_p5 = scmp.lt.u32.totalorder %s3109_s29, %s3960_s7 }
  0x4e   :  { %p3115_p6 = pnand %p3113_p5, %p3110_p4 }
  0x50   :  { %3118 = shalt.err (!%p3115_p6)
}
  0x51   :  { %s3119_s2 = scalar_lea.vmem %s66_s26, 512  ;;  %p3124_p8 = scmp.lt.s32.totalorder %s66_s26, %s66_s26 }
  0x52   :  { %p3120_p7 = scmp.ne.s32.totalorder %s66_s26, %s3119_s2  ;;  %p3125_p9 = scmp.lt.s32.totalorder %s3119_s2, %s3119_s2 }
  0x54   :  { %p3126_p10 = por %p3125_p9, %p3124_p8 }
  0x56   :  { %p3127_p11 = pnand %p3126_p10, %p3120_p7 }
  0x58   :  { %3130 = shalt.err (!%p3127_p11)
}
  0x59   :  { %71 = dma.hbm_to_vmem [thread:$0]  %s3960_s7, 512, %s66_s26, [#allocation6], %s3259_s21, %s3259_s21, %s3260_s27  }
  0x5a   :  { %s3131_s30 = scalar_lea.hbm %s3962_s9, 16 }
  0x5b   :  { %p3132_p12 = scmp.ne.s32.totalorder %s3962_s9, %s3131_s30  ;;  %p3135_p13 = scmp.lt.u32.totalorder %s3131_s30, %s3962_s9 }
  0x5d   :  { %p3137_p0 = pnand %p3135_p13, %p3132_p12 }
  0x5f   :  { %3140 = shalt.err (!%p3137_p0)
}
  0x60   :  { %s3141_s29 = scalar_lea.vmem %s89_s28, 16  ;;  %s3145_s16 = scalar_lea.vmem %s89_s28, 32 }
  0x61   :  { %p3142_p1 = scmp.ne.s32.totalorder %s89_s28, %s3141_s29  ;;  %p3146_p2 = scmp.lt.s32.totalorder %s89_s28, %s89_s28 }
  0x62   :  { %p3147_p3 = scmp.lt.s32.totalorder %s3145_s16, %s3141_s29 }
  0x64   :  { %p3148_p4 = por %p3147_p3, %p3146_p2 }
  0x66   :  { %p3149_p5 = pnand %p3148_p4, %p3142_p1 }
  0x68   :  { %3152 = shalt.err (!%p3149_p5)
}
  0x69   :  { %91 = dma.hbm_to_vmem [thread:$0]  %s3962_s9, 16, %s89_s28, [#allocation9]  }
  0x6a   :  { %s3263_s18 = smov [#allocation13]   ;;  %s3264_s22 = smov [#allocation14]  }
  0x6b   :  { %s110_s20 = sshll.u32 %s3263_s18, 4  ;;  %s122_s2 = sshll.u32 %s3264_s22, 4  ;;  %s111_s20 = int_to_ptr.vmem [resolvable:$true] %s110_s20  ;;  %s123_s2 = int_to_ptr.vmem [resolvable:$true] %s122_s2 }
  0x6c   :  { %s3153_s24 = scalar_lea.hbm %s3964_s11, 16 }
  0x6d   :  { %p3154_p6 = scmp.ne.s32.totalorder %s3964_s11, %s3153_s24  ;;  %p3157_p7 = scmp.lt.u32.totalorder %s3153_s24, %s3964_s11 }
  0x6f   :  { %p3159_p8 = pnand %p3157_p7, %p3154_p6 }
  0x71   :  { %3162 = shalt.err (!%p3159_p8)
}
  0x72   :  { %s3163_s9 = scalar_lea.vmem %s111_s20, 16  ;;  %s3167_s28 = scalar_lea.vmem %s111_s20, 32 }
  0x73   :  { %p3164_p9 = scmp.ne.s32.totalorder %s111_s20, %s3163_s9  ;;  %p3168_p10 = scmp.lt.s32.totalorder %s111_s20, %s111_s20 }
  0x74   :  { %p3169_p11 = scmp.lt.s32.totalorder %s3167_s28, %s3163_s9 }
  0x76   :  { %p3170_p12 = por %p3169_p11, %p3168_p10 }
  0x78   :  { %p3171_p13 = pnand %p3170_p12, %p3164_p9 }
  0x7a   :  { %3174 = shalt.err (!%p3171_p13)
}
  0x7b   :  { %113 = dma.hbm_to_vmem [thread:$0]  %s3964_s11, 16, %s111_s20, [#allocation12]  }
  0x7c   :  { %s3175_s7 = scalar_lea.hbm %s3966_s13, 16 }
  0x7d   :  { %p3176_p0 = scmp.ne.s32.totalorder %s3966_s13, %s3175_s7  ;;  %p3179_p1 = scmp.lt.u32.totalorder %s3175_s7, %s3966_s13 }
  0x7f   :  { %p3181_p2 = pnand %p3179_p1, %p3176_p0 }
  0x81   :  { %3184 = shalt.err (!%p3181_p2)
}
  0x82   :  { %s3185_s23 = scalar_lea.vmem %s123_s2, 16  ;;  %s3189_s24 = scalar_lea.vmem %s123_s2, 32 }
  0x83   :  { %p3186_p3 = scmp.ne.s32.totalorder %s123_s2, %s3185_s23  ;;  %p3190_p4 = scmp.lt.s32.totalorder %s123_s2, %s123_s2 }
  0x84   :  { %p3191_p5 = scmp.lt.s32.totalorder %s3189_s24, %s3185_s23 }
  0x86   :  { %p3192_p6 = por %p3191_p5, %p3190_p4 }
  0x88   :  { %p3193_p7 = pnand %p3192_p6, %p3186_p3 }
  0x8a   :  { %3196 = shalt.err (!%p3193_p7)
}
  0x8b   :  { %125 = dma.hbm_to_vmem [thread:$0]  %s3966_s13, 16, %s123_s2, [#allocation15]  }
  0x8c   :  { %3241 = dma.done.wait [#allocation3], 256  }
  0x8d   :  { %3242 = vsyncadd [#allocation3], 4294967040 }
  0x8e   :  { %3243 = dma.done.wait [#allocation6], 528  }
  0x8f   :  { %3244 = vsyncadd [#allocation6], 4294966768 }
  0x90   :  { %3245 = dma.done.wait [#allocation9], 32  }
  0x91   :  { %3246 = vsyncadd [#allocation9], 4294967264 }
  0x92   :  { %3247 = dma.done.wait [#allocation12], 528  }
  0x93   :  { %3248 = vsyncadd [#allocation12], 4294966768 }
  0x94   :  { %3249 = dma.done.wait [#allocation15], 16  }
  0x95   :  { %3250 = vsyncadd [#allocation15], 4294967280  ;;  %v3265_v0 = vmov 0.0|0.0   ;;  %vm3266_vm0 = vmmov 0   ;;  %v3267_v1 = vmov 0.0   ;;  %vm167_vm1 = vcmask 130048  }
  0x96   :  { %2778 = vmatprep.subr.bf16.mxu1 %v3265_v0  ;;  %2573 = vmatprep.mubr.msk.f32.mxu1 %vm3266_vm0, %v3267_v1  ;;  %v153_v2 = vld [vmem:[#allocation2] sm:$0xff]  ;;  %v154_v3 = vld [vmem:[#allocation2 + $0x8] sm:$0xff]  ;;  %v157_v9 = vld [vmem:[%s3956_s3 + $0x10] sm:$0xff]  ;;  %vm261_vm2 = vcmask 261120   ;;  %vm259_vm3 = vcmask 1040384   ;;  %s3269_s18 = smov 96  }
  0x97   :  { %v155_v4 = vld [vmem:[%s3956_s3] sm:$0xff]  ;;  %v2774_v5 = vpack.c.bf16 %v154_v3, %v153_v2  ;;  %v156_v6 = vld [vmem:[%s3956_s3 + $0x8] sm:$0xff]  ;;  %v158_v10 = vld [vmem:[%s3956_s3 + $0x18] sm:$0xff]  ;;  %s3270_s22 = smov 32   ;;  %vm1140_vm4 = vcmask 1041408   ;;  %vm1142_vm5 = vcmask 1042432  }
  0x98   :  { %v150_v7 = vld [vmem:[%s3953_s0] sm:$0xff]  ;;  %v3478_v8 = vpack.c.bf16 %v156_v6, %v155_v4  ;;  %v2406_v11 = vld [vmem:[%s3953_s0 + $0x8] sm:$0xff]  ;;  %v3491_v12 = vpack.c.bf16 %v158_v10, %v157_v9  ;;  %v3520_v19 = vld [vmem:[#allocation5] ss:$0 sm:$0xff]  ;;  %vm1144_vm6 = vcmask 1043456   ;;  %vm1146_vm7 = vcmask 1044480  }
  0x99   :  { %2562 = vmatprep.mubr.msk.f32.mxu0 %vm167_vm1, %v150_v7  ;;  %2775 = vmatprep.subr.bf16.mxu0 %v2774_v5  ;;  %v3500_v13 = vld [vmem:[%s3954_s1] sm:$0x3]  ;;  %vm1148_vm8 = vcmask 1045504   ;;  %vm1150_vm9 = vcmask 1046528   ;;  %vm1109_vm10 = vcmask 254976   ;;  %s3271_s16 = smov [#allocation17]  }
  0x9a   :  { %2780 = vmatpush3.bf16.msra.mxu1 %v3478_v8  ;;  %2777 = vmatpush3.bf16.msra.mxu0 %v2774_v5  ;;  %v2407_v14 = vld [vmem:[%s3957_s4] ss:$0 sm:$0xff]  ;;  %s3268_s4 = smov 64   ;;  %s2386_s7 = sshll.u32 %s3271_s16, 4  ;;  %s2387_s7 = int_to_ptr.vmem [resolvable:$true] %s2386_s7 }
  0x9b   :  { %2781 = vmatprep.subr.bf16.mxu1 %v3265_v0  ;;  %2784 = vmatprep.subr.bf16.mxu0 %v3265_v0  ;;  %s3197_s3 = scalar_lea.vmem %s2387_s7, 64  ;;  %p3202_p9 = scmp.lt.s32.totalorder %s2387_s7, %s2387_s7 }
  0x9c   :  { %p3198_p8 = scmp.ne.s32.totalorder %s2387_s7, %s3197_s3  ;;  %p3203_p10 = scmp.lt.s32.totalorder %s3197_s3, %s3197_s3 }
  0x9d   :  { %2563 = vmatmul.mubr.msk.f32.vlgmr.msra.gmra.mrb[0].mxu0 %vm167_vm1, %v2406_v11 }
  0x9e   :  { %2783 = vmatpush3.bf16.msra.mxu1 %v3491_v12  ;;  %2786 = vmatpush3.bf16.msra.mxu0 %v3478_v8  ;;  %p3204_p11 = por %p3203_p10, %p3202_p9 }
  0x9f   :  { %2787 = vmatprep.subr.bf16.mxu0 %v3265_v0  ;;  %2584 = vmatprep.mubr.msk.f32.mxu0 %vm3266_vm0, %v3267_v1 }
  0xa0   :  { %2790 = vmatprep.subr.bf16.mxu1 %v3265_v0  ;;  %p3205_p12 = pnand %p3204_p11, %p3198_p8 }
  0xa1   :  { %2574 = vmatmul.mubr.msk.f32.vlgmr.msra.gmra.mrb[0].mxu1 %vm261_vm2, %v3500_v13 }
  0xa2   :  { %2789 = vmatpush3.bf16.msra.mxu0 %v3491_v12  ;;  %2792 = vmatpush3.bf16.msra.mxu1 %v3478_v8 }
  0xa3   :  { %2793 = vmatprep.subr.bf16.mxu1 %v3265_v0  ;;  %2595 = vmatprep.mubr.msk.f32.mxu1 %vm3266_vm0, %v3267_v1 }
  0xa4   :  { %2796 = vmatprep.subr.bf16.mxu0 %v3265_v0 }
  0xa6   :  { %2795 = vmatpush3.bf16.msra.mxu1 %v3491_v12 }
  0xa7   :  { %2802 = vmatprep.subr.bf16.mxu1 %v3265_v0 }
 0x170   :  { %v2564_v15 = vpop.f32.mrb[0].mxu0 }
 0x171   :  { %v246_v16 = vadd.f32 %v2564_v15, %v2407_v14  ;;  %v240_v17 = vpop.f32.mrb[1].mxu0 }
 0x172   :  { %v241_v18 = vadd.f32 %v2407_v14, %v240_v17 }
 0x173   :  { %v257_v20 = vrot.slane %v246_v16, 7  ;;  %v471_v21 = vrot.slane %v246_v16, 1  ;;  %v577_v22 = vrot.slane %v246_v16, 2  ;;  %v683_v23 = vrot.slane %v246_v16, 3 }
 0x174   :  { %v331_v24 = vpop.f32.mrb[0].mxu1  ;;  %v365_v25 = vrot.slane %v241_v18, 1  ;;  %v469_v26 = vrot.slane %v241_v18, 2  ;;  %v575_v27 = vrot.slane %v241_v18, 3  ;;  %v681_v28 = vrot.slane %v241_v18, 4 }
 0x175   :  { %v260_v29 = vsel %vm259_vm3, %v241_v18, %v257_v20  ;;  %v332_v30 = vadd.f32 %v3520_v19, %v331_v24  ;;  %v2575_v31 = vpop.f32.mrb[1].mxu1  ;;  %v787_v32 = vrot.slane %v241_v18, 5  ;;  %v789_v33 = vrot.slane %v246_v16, 4 }
 0x176   :  { %v367_v34 = vsel %vm259_vm3, %v365_v25, %v246_v16  ;;  %v3526_v35 = vsel %vm259_vm3, %v469_v26, %v471_v21  ;;  %v3529_v36 = vsel %vm259_vm3, %v575_v27, %v577_v22  ;;  %v3532_v37 = vsel %vm259_vm3, %v681_v28, %v683_v23 }
 0x177   :  { %343 = vrot.lane.b32.xlu0 %v332_v30, %s3268_s4  ;;  %v3536_v38 = vsel %vm259_vm3, %v787_v32, %v789_v33  ;;  %v893_v39 = vrot.slane %v241_v18, 6  ;;  %v895_v40 = vrot.slane %v246_v16, 5  ;;  %v999_v41 = vrot.slane %v241_v18, 7 }
 0x178   :  { %v1001_v42 = vrot.slane %v246_v16, 6  ;;  %v335_v45 = vadd.f32 %v332_v30, %v260_v29 }
 0x179   :  { %v3539_v43 = vsel %vm259_vm3, %v893_v39, %v895_v40 }
 0x17a   :  { %v3542_v44 = vsel %vm259_vm3, %v999_v41, %v1001_v42  ;;  %v2412_v46 = vmul.f32 -1.442695, %v335_v45 }
 0x17c   :  { %2917 = vpow2.f32 %v2412_v46 }
 0x186   :  { %v2918_v47 = vpop.eup %2917 }
 0x187   :  { %v339_v48 = vadd.f32 1.0, %v2918_v47 }
 0x189   :  { %2919 = vrcp.f32 %v339_v48 }
 0x193   :  { %v2920_v49 = vpop.eup %2919 }
 0x194   :  { %v353_v56 = vsub.f32 1.0, %v2920_v49 }
 0x1e9   :  { %v344_v50 = vpop.permute.xlu0 %343 }
 0x1ea   :  { %v346_v51 = vmul.f32 %v2920_v49, %v344_v50 }
 0x1ec   :  { %348 = vrot.lane.b32.xlu0 %v346_v51, %s3268_s4 }
 0x25e   :  { %v349_v52 = vpop.permute.xlu0 %348 }
 0x25f   :  { %v351_v53 = vadd.f32 %v349_v52, %v260_v29 }
 0x261   :  { %2921 = vtanh.f32 %v351_v53 }
 0x26b   :  { %v2922_v54 = vpop.eup %2921 }
 0x26c   :  { %355 = vrot.lane.b32.xlu1 %v2922_v54, %s3269_s18 }
 0x270   :  { %359 = vrot.lane.b32.xlu1 %v3500_v13, %s3270_s22 }
 0x2de   :  { %v356_v55 = vpop.permute.xlu1 %355 }
 0x2df   :  { %v358_v58 = vmul.f32 %v356_v55, %v353_v56 }
 0x2e2   :  { %v360_v57 = vpop.permute.xlu1 %359 }
 0x2e3   :  { %v362_v59 = vmul.f32 %v2920_v49, %v360_v57 }
 0x2e5   :  { %v3548_v60 = vadd.f32 %v362_v59, %v358_v58 }
 0x2e7   :  { %369 = vrot.lane.b32.xlu0 %v3548_v60, %s3269_s18 }
 0x359   :  { %v370_v61 = vpop.permute.xlu0 %369 }
 0x35a   :  { %2585 = vmatmul.mubr.msk.f32.vlgmr.msra.gmra.mrb[2].mxu0 %vm261_vm2, %v370_v61 }
 0x35b   :  { %2798 = vmatpush3.bf16.msra.mxu0 %v3478_v8  ;;  %2606 = vmatprep.mubr.msk.f32.mxu0 %vm3266_vm0, %v3267_v1 }
 0x35c   :  { %2799 = vmatprep.subr.bf16.mxu0 %v3265_v0 }
 0x35f   :  { %2801 = vmatpush3.bf16.msra.mxu0 %v3491_v12 }
 0x360   :  { %2808 = vmatprep.subr.bf16.mxu0 %v3265_v0 }
 0x42d   :  { %v439_v62 = vpop.f32.mrb[2].mxu0 }
 0x42e   :  { %v440_v63 = vadd.f32 %v3520_v19, %v439_v62  ;;  %v2586_v2 = vpop.f32.mrb[3].mxu0 }
 0x430   :  { %451 = vrot.lane.b32.xlu1 %v440_v63, %s3268_s4  ;;  %v443_v3 = vadd.f32 %v440_v63, %v367_v34 }
 0x432   :  { %v2414_v4 = vmul.f32 -1.442695, %v443_v3 }
 0x434   :  { %2923 = vpow2.f32 %v2414_v4 }
 0x43e   :  { %v2924_v5 = vpop.eup %2923 }
 0x43f   :  { %v447_v6 = vadd.f32 1.0, %v2924_v5 }
 0x441   :  { %2925 = vrcp.f32 %v447_v6 }
 0x44b   :  { %v2926_v7 = vpop.eup %2925 }
 0x44c   :  { %v461_v15 = vsub.f32 1.0, %v2926_v7  ;;  %v467_v17 = vmul.f32 %v2926_v7, %v3548_v60 }
 0x4a2   :  { %v452_v9 = vpop.permute.xlu1 %451 }
 0x4a3   :  { %v454_v10 = vmul.f32 %v2926_v7, %v452_v9 }
 0x4a5   :  { %456 = vrot.lane.b32.xlu0 %v454_v10, %s3268_s4 }
 0x517   :  { %v457_v11 = vpop.permute.xlu0 %456 }
 0x518   :  { %v459_v13 = vadd.f32 %v457_v11, %v367_v34 }
 0x51a   :  { %2927 = vtanh.f32 %v459_v13 }
 0x524   :  { %v2928_v14 = vpop.eup %2927 }
 0x525   :  { %463 = vrot.lane.b32.xlu1 %v2928_v14, %s3269_s18 }
 0x597   :  { %v464_v16 = vpop.permute.xlu1 %463 }
 0x598   :  { %v466_v18 = vmul.f32 %v464_v16, %v461_v15 }
 0x59a   :  { %v3564_v20 = vadd.f32 %v467_v17, %v466_v18 }
 0x59c   :  { %475 = vrot.lane.b32.xlu0 %v3564_v20, %s3269_s18 }
 0x60e   :  { %v476_v21 = vpop.permute.xlu0 %475 }
 0x60f   :  { %2596 = vmatmul.mubr.msk.f32.vlgmr.msra.gmra.mrb[2].mxu1 %vm261_vm2, %v476_v21 }
 0x610   :  { %2804 = vmatpush3.bf16.msra.mxu1 %v3478_v8  ;;  %2617 = vmatprep.mubr.msk.f32.mxu1 %vm3266_vm0, %v3267_v1 }
 0x611   :  { %2805 = vmatprep.subr.bf16.mxu1 %v3265_v0 }
 0x614   :  { %2807 = vmatpush3.bf16.msra.mxu1 %v3491_v12 }
 0x615   :  { %2814 = vmatprep.subr.bf16.mxu1 %v3265_v0 }
 0x6e2   :  { %v545_v22 = vpop.f32.mrb[2].mxu1 }
 0x6e3   :  { %v546_v23 = vadd.f32 %v3520_v19, %v545_v22  ;;  %v2597_v24 = vpop.f32.mrb[3].mxu1 }
 0x6e5   :  { %557 = vrot.lane.b32.xlu1 %v546_v23, %s3268_s4  ;;  %v549_v25 = vadd.f32 %v546_v23, %v3526_v35 }
 0x6e7   :  { %v2416_v26 = vmul.f32 -1.442695, %v549_v25 }
 0x6e9   :  { %2929 = vpow2.f32 %v2416_v26 }
 0x6f3   :  { %v2930_v27 = vpop.eup %2929 }
 0x6f4   :  { %v553_v28 = vadd.f32 1.0, %v2930_v27 }
 0x6f6   :  { %2931 = vrcp.f32 %v553_v28 }
 0x700   :  { %v2932_v29 = vpop.eup %2931 }
 0x701   :  { %v567_v39 = vsub.f32 1.0, %v2932_v29  ;;  %v573_v41 = vmul.f32 %v2932_v29, %v3564_v20 }
 0x757   :  { %v558_v30 = vpop.permute.xlu1 %557 }
 0x758   :  { %v560_v31 = vmul.f32 %v2932_v29, %v558_v30 }
 0x75a   :  { %562 = vrot.lane.b32.xlu0 %v560_v31, %s3268_s4 }
 0x7cc   :  { %v563_v32 = vpop.permute.xlu0 %562 }
 0x7cd   :  { %v565_v33 = vadd.f32 %v563_v32, %v3526_v35 }
 0x7cf   :  { %2933 = vtanh.f32 %v565_v33 }
 0x7d9   :  { %v2934_v34 = vpop.eup %2933 }
 0x7da   :  { %569 = vrot.lane.b32.xlu1 %v2934_v34, %s3269_s18 }
 0x84c   :  { %v570_v40 = vpop.permute.xlu1 %569 }
 0x84d   :  { %v572_v42 = vmul.f32 %v570_v40, %v567_v39 }
 0x84f   :  { %v3582_v45 = vadd.f32 %v573_v41, %v572_v42 }
 0x851   :  { %581 = vrot.lane.b32.xlu0 %v3582_v45, %s3269_s18 }
 0x8c3   :  { %v582_v46 = vpop.permute.xlu0 %581 }
 0x8c4   :  { %2607 = vmatmul.mubr.msk.f32.vlgmr.msra.gmra.mrb[4].mxu0 %vm261_vm2, %v582_v46 }
 0x8c5   :  { %2810 = vmatpush3.bf16.msra.mxu0 %v3478_v8  ;;  %2628 = vmatprep.mubr.msk.f32.mxu0 %vm3266_vm0, %v3267_v1 }
 0x8c6   :  { %2811 = vmatprep.subr.bf16.mxu0 %v3265_v0 }
 0x8c9   :  { %2813 = vmatpush3.bf16.msra.mxu0 %v3491_v12 }
 0x8ca   :  { %2820 = vmatprep.subr.bf16.mxu0 %v3265_v0 }
 0x997   :  { %v651_v35 = vpop.f32.mrb[4].mxu0 }
 0x998   :  { %v652_v47 = vadd.f32 %v3520_v19, %v651_v35  ;;  %v2608_v48 = vpop.f32.mrb[5].mxu0 }
 0x99a   :  { %663 = vrot.lane.b32.xlu1 %v652_v47, %s3268_s4  ;;  %v655_v49 = vadd.f32 %v652_v47, %v3529_v36 }
 0x99c   :  { %v2418_v50 = vmul.f32 -1.442695, %v655_v49 }
 0x99e   :  { %2935 = vpow2.f32 %v2418_v50 }
 0x9a8   :  { %v2936_v51 = vpop.eup %2935 }
 0x9a9   :  { %v659_v52 = vadd.f32 1.0, %v2936_v51 }
 0x9ab   :  { %2937 = vrcp.f32 %v659_v52 }
 0x9b5   :  { %v2938_v53 = vpop.eup %2937 }
 0x9b6   :  { %v673_v59 = vsub.f32 1.0, %v2938_v53  ;;  %v679_v62 = vmul.f32 %v2938_v53, %v3582_v45 }
 0xa0c   :  { %v664_v54 = vpop.permute.xlu1 %663 }
 0xa0d   :  { %v666_v55 = vmul.f32 %v2938_v53, %v664_v54 }
 0xa0f   :  { %668 = vrot.lane.b32.xlu0 %v666_v55, %s3268_s4 }
 0xa81   :  { %v669_v56 = vpop.permute.xlu0 %668 }
 0xa82   :  { %v671_v57 = vadd.f32 %v669_v56, %v3529_v36 }
 0xa84   :  { %2939 = vtanh.f32 %v671_v57 }
 0xa8e   :  { %v2940_v58 = vpop.eup %2939 }
 0xa8f   :  { %675 = vrot.lane.b32.xlu1 %v2940_v58, %s3269_s18 }
 0xb01   :  { %v676_v61 = vpop.permute.xlu1 %675 }
 0xb02   :  { %v678_v63 = vmul.f32 %v676_v61, %v673_v59 }
 0xb04   :  { %v3600_v2 = vadd.f32 %v679_v62, %v678_v63 }
 0xb06   :  { %687 = vrot.lane.b32.xlu0 %v3600_v2, %s3269_s18 }
 0xb78   :  { %v688_v3 = vpop.permute.xlu0 %687 }
 0xb79   :  { %2618 = vmatmul.mubr.msk.f32.vlgmr.msra.gmra.mrb[4].mxu1 %vm261_vm2, %v688_v3 }
 0xb7a   :  { %2816 = vmatpush3.bf16.msra.mxu1 %v3478_v8  ;;  %2639 = vmatprep.mubr.msk.f32.mxu1 %vm3266_vm0, %v3267_v1 }
 0xb7b   :  { %2817 = vmatprep.subr.bf16.mxu1 %v3265_v0 }
 0xb7e   :  { %2819 = vmatpush3.bf16.msra.mxu1 %v3491_v12 }
 0xc4c   :  { %v757_v36 = vpop.f32.mrb[4].mxu1 }
 0xc4d   :  { %v758_v4 = vadd.f32 %v3520_v19, %v757_v36  ;;  %v2619_v5 = vpop.f32.mrb[5].mxu1 }
 0xc4f   :  { %769 = vrot.lane.b32.xlu1 %v758_v4, %s3268_s4  ;;  %v761_v6 = vadd.f32 %v758_v4, %v3532_v37 }
 0xc51   :  { %v2420_v7 = vmul.f32 -1.442695, %v761_v6 }
 0xc53   :  { %2941 = vpow2.f32 %v2420_v7 }
 0xc5d   :  { %v2942_v9 = vpop.eup %2941 }
 0xc5e   :  { %v765_v10 = vadd.f32 1.0, %v2942_v9 }
 0xc60   :  { %2943 = vrcp.f32 %v765_v10 }
 0xc6a   :  { %v2944_v11 = vpop.eup %2943 }
 0xc6b   :  { %v779_v18 = vsub.f32 1.0, %v2944_v11  ;;  %v785_v22 = vmul.f32 %v2944_v11, %v3600_v2 }
 0xcc1   :  { %v770_v13 = vpop.permute.xlu1 %769 }
 0xcc2   :  { %v772_v14 = vmul.f32 %v2944_v11, %v770_v13 }
 0xcc4   :  { %774 = vrot.lane.b32.xlu0 %v772_v14, %s3268_s4 }
 0xd36   :  { %v775_v15 = vpop.permute.xlu0 %774 }
 0xd37   :  { %v777_v16 = vadd.f32 %v775_v15, %v3532_v37 }
 0xd39   :  { %2945 = vtanh.f32 %v777_v16 }
 0xd43   :  { %v2946_v17 = vpop.eup %2945 }
 0xd44   :  { %781 = vrot.lane.b32.xlu1 %v2946_v17, %s3269_s18 }
 0xdb6   :  { %v782_v21 = vpop.permute.xlu1 %781 }
 0xdb7   :  { %v784_v23 = vmul.f32 %v782_v21, %v779_v18  ;;  %v1164_v18 = vld [vmem:[#allocation7 + $0x8] sm:$0xff]  ;;  %v1165_v21 = vld [vmem:[#allocation7 + $0x10] sm:$0xff] }
 0xdb9   :  { %v3617_v24 = vadd.f32 %v785_v22, %v784_v23  ;;  %v1166_v23 = vld [vmem:[#allocation7 + $0x18] sm:$0xff] }
 0xdbb   :  { %793 = vrot.lane.b32.xlu0 %v3617_v24, %s3269_s18 }
 0xe2d   :  { %v794_v25 = vpop.permute.xlu0 %793 }
 0xe2e   :  { %2629 = vmatmul.mubr.msk.f32.vlgmr.msra.gmra.mrb[6].mxu0 %vm261_vm2, %v794_v25  ;;  %v1159_v25 = vld [vmem:[%s3959_s6] sm:$0xff] }
 0xe2f   :  { %2822 = vmatpush3.bf16.msra.mxu0 %v3478_v8  ;;  %2650 = vmatprep.mubr.msk.f32.mxu0 %vm3266_vm0, %v3267_v1 }
 0xe30   :  { %2823 = vmatprep.subr.bf16.mxu0 %v3265_v0 }
 0xe33   :  { %2825 = vmatpush3.bf16.msra.mxu0 %v3491_v12 }
 0xe34   :  { %2834 = vmatprep.subr.bf16.mxu0 %v3265_v0 }
 0xf01   :  { %v863_v37 = vpop.f32.mrb[6].mxu0 }
 0xf02   :  { %v864_v26 = vadd.f32 %v3520_v19, %v863_v37  ;;  %v2630_v27 = vpop.f32.mrb[7].mxu0  ;;  %v1160_v37 = vld [vmem:[%s3959_s6 + $0x8] sm:$0xff] }
 0xf03   :  { %v3674_v27 = vpack.c.bf16 %v1166_v23, %v1165_v21 }
 0xf04   :  { %875 = vrot.lane.b32.xlu1 %v864_v26, %s3268_s4  ;;  %v867_v28 = vadd.f32 %v864_v26, %v3536_v38  ;;  %v1161_v26 = vld [vmem:[%s3959_s6 + $0x10] sm:$0xff] }
 0xf06   :  { %v2422_v29 = vmul.f32 -1.442695, %v867_v28  ;;  %v2826_v28 = vpack.c.bf16 %v1160_v37, %v1159_v25 }
 0xf08   :  { %2947 = vpow2.f32 %v2422_v29  ;;  %2827 = vmatprep.subr.bf16.mxu1 %v2826_v28 }
 0xf12   :  { %v2948_v8 = vpop.eup %2947 }
 0xf13   :  { %v871_v30 = vadd.f32 1.0, %v2948_v8 }
 0xf15   :  { %2949 = vrcp.f32 %v871_v30  ;;  %v3682_v30 = vld [vmem:[%s3954_s1 + $0x2] sm:$0x3] }
 0xf1f   :  { %v2950_v31 = vpop.eup %2949 }
 0xf20   :  { %v885_v40 = vsub.f32 1.0, %v2950_v31  ;;  %v891_v42 = vmul.f32 %v2950_v31, %v3617_v24 }
 0xf76   :  { %v876_v32 = vpop.permute.xlu1 %875 }
 0xf77   :  { %v878_v33 = vmul.f32 %v2950_v31, %v876_v32  ;;  %v1111_v31 = vrot.slane %v3564_v20, 7  ;;  %v1113_v32 = vrot.slane %v3582_v45, 6 }
 0xf79   :  { %880 = vrot.lane.b32.xlu0 %v878_v33, %s3268_s4  ;;  %v1125_v33 = vrot.slane %v3548_v60, 1 }
 0xfeb   :  { %v881_v12 = vpop.permute.xlu0 %880 }
 0xfec   :  { %v883_v34 = vadd.f32 %v881_v12, %v3536_v38  ;;  %v1139_v12 = vsel %vm259_vm3, %v3548_v60, %v1111_v31 }
 0xfee   :  { %2951 = vtanh.f32 %v883_v34  ;;  %v1152_v34 = vsel %vm259_vm3, %v1125_v33, %v3564_v20 }
 0xff8   :  { %v2952_v39 = vpop.eup %2951 }
 0xff9   :  { %887 = vrot.lane.b32.xlu1 %v2952_v39, %s3269_s18  ;;  %v1127_v39 = vrot.slane %v3582_v45, 7 }
0x106b   :  { %v888_v41 = vpop.permute.xlu1 %887 }
0x106c   :  { %v890_v46 = vmul.f32 %v888_v41, %v885_v40  ;;  %v1115_v40 = vrot.slane %v3600_v2, 5  ;;  %v1129_v41 = vrot.slane %v3600_v2, 6 }
0x106e   :  { %v3635_v35 = vadd.f32 %v891_v42, %v890_v46  ;;  %v1141_v46 = vsel %vm1140_vm4, %v1139_v12, %v1113_v32 }
0x1070   :  { %899 = vrot.lane.b32.xlu0 %v3635_v35, %s3269_s18  ;;  %v1119_v60 = vrot.slane %v3635_v35, 3  ;;  %v1133_v20 = vrot.slane %v3635_v35, 4 }
0x10e2   :  { %v900_v47 = vpop.permute.xlu0 %899 }
0x10e3   :  { %2640 = vmatmul.mubr.msk.f32.vlgmr.msra.gmra.mrb[6].mxu1 %vm261_vm2, %v900_v47  ;;  %v1117_v47 = vrot.slane %v3617_v24, 4 }
0x10e4   :  { %2829 = vmatpush3.bf16.msra.mxu1 %v2826_v28 }
0x11b6   :  { %v969_v48 = vpop.f32.mrb[6].mxu1 }
0x11b7   :  { %v970_v38 = vadd.f32 %v3520_v19, %v969_v48  ;;  %v2641_v49 = vpop.f32.mrb[7].mxu1  ;;  %v1131_v48 = vrot.slane %v3617_v24, 5  ;;  %v1143_v24 = vsel %vm1142_vm5, %v1141_v46, %v1115_v40 }
0x11b9   :  { %981 = vrot.lane.b32.xlu1 %v970_v38, %s3268_s4  ;;  %v973_v50 = vadd.f32 %v970_v38, %v3539_v43 }
0x11bb   :  { %v2424_v51 = vmul.f32 -1.442695, %v973_v50 }
0x11bd   :  { %2953 = vpow2.f32 %v2424_v51  ;;  %v1153_v51 = vsel %vm1140_vm4, %v1152_v34, %v1127_v39 }
0x11c7   :  { %v2954_v52 = vpop.eup %2953 }
0x11c8   :  { %v977_v53 = vadd.f32 1.0, %v2954_v52 }
0x11ca   :  { %2955 = vrcp.f32 %v977_v53  ;;  %v1154_v53 = vsel %vm1142_vm5, %v1153_v51, %v1129_v41 }
0x11d4   :  { %v2956_v54 = vpop.eup %2955 }
0x11d5   :  { %v991_v61 = vsub.f32 1.0, %v2956_v54  ;;  %v997_v63 = vmul.f32 %v2956_v54, %v3635_v35  ;;  %v1155_v35 = vsel %vm1144_vm6, %v1154_v53, %v1131_v48 }
0x122b   :  { %v982_v55 = vpop.permute.xlu1 %981 }
0x122c   :  { %v984_v56 = vmul.f32 %v2956_v54, %v982_v55  ;;  %v1145_v54 = vsel %vm1144_vm6, %v1143_v24, %v1117_v47 }
0x122e   :  { %986 = vrot.lane.b32.xlu0 %v984_v56, %s3268_s4  ;;  %v1147_v56 = vsel %vm1146_vm7, %v1145_v54, %v1119_v60 }
0x12a0   :  { %v987_v57 = vpop.permute.xlu0 %986 }
0x12a1   :  { %v989_v58 = vadd.f32 %v987_v57, %v3539_v43 }
0x12a3   :  { %2957 = vtanh.f32 %v989_v58  ;;  %v1156_v58 = vsel %vm1146_vm7, %v1155_v35, %v1133_v20 }
0x12ad   :  { %v2958_v59 = vpop.eup %2957 }
0x12ae   :  { %993 = vrot.lane.b32.xlu1 %v2958_v59, %s3269_s18 }
0x1320   :  { %v994_v62 = vpop.permute.xlu1 %993 }
0x1321   :  { %v996_v3 = vmul.f32 %v994_v62, %v991_v61 }
0x1323   :  { %v3647_v36 = vadd.f32 %v997_v63, %v996_v3  ;;  %v3729_v3 = vld [vmem:[#allocation10] ss:$0 sm:$0xff] }
0x1325   :  { %1005 = vrot.lane.b32.xlu0 %v3647_v36, %s3269_s18  ;;  %v1121_v50 = vrot.slane %v3647_v36, 2  ;;  %v1135_v2 = vrot.slane %v3647_v36, 3 }
0x1327   :  { %v1149_v59 = vsel %vm1148_vm8, %v1147_v56, %v1121_v50  ;;  %v1157_v61 = vsel %vm1148_vm8, %v1156_v58, %v1135_v2 }
0x1397   :  { %v1006_v4 = vpop.permute.xlu0 %1005 }
0x1398   :  { %2651 = vmatmul.mubr.msk.f32.vlgmr.msra.gmra.mrb[8].mxu0 %vm261_vm2, %v1006_v4 }
0x1399   :  { %2672 = vmatprep.mubr.msk.f32.mxu0 %vm3266_vm0, %v3267_v1 }
0x146b   :  { %v1075_v43 = vpop.f32.mrb[8].mxu0 }
0x146c   :  { %v1076_v5 = vadd.f32 %v3520_v19, %v1075_v43  ;;  %v2652_v6 = vpop.f32.mrb[9].mxu0  ;;  %v1163_v19 = vld [vmem:[#allocation7] sm:$0xff] }
0x146d   :  { %v3659_v22 = vpack.c.bf16 %v1164_v18, %v1163_v19 }
0x146e   :  { %1087 = vrot.lane.b32.xlu1 %v1076_v5, %s3268_s4  ;;  %v1079_v7 = vadd.f32 %v1076_v5, %v3542_v44 }
0x146f   :  { %2836 = vmatpush3.bf16.msra.mxu0 %v3659_v22 }
0x1470   :  { %v2426_v9 = vmul.f32 -1.442695, %v1079_v7  ;;  %2837 = vmatprep.subr.bf16.mxu0 %v3265_v0  ;;  %v2427_v7 = vld [vmem:[#allocation8] ss:$0 sm:$0xff] }
0x1472   :  { %2959 = vpow2.f32 %v2426_v9 }
0x1473   :  { %2839 = vmatpush3.bf16.msra.mxu0 %v3674_v27 }
0x1474   :  { %2846 = vmatprep.subr.bf16.mxu0 %v3265_v0 }
0x1476   :  { %2673 = vmatmul.mubr.msk.f32.vlgmr.msra.gmra.mrb[10].mxu0 %vm261_vm2, %v3682_v30 }
0x1477   :  { %2848 = vmatpush3.bf16.msra.mxu0 %v3659_v22  ;;  %2694 = vmatprep.mubr.msk.f32.mxu0 %vm3266_vm0, %v3267_v1 }
0x1478   :  { %2849 = vmatprep.subr.bf16.mxu0 %v3265_v0 }
0x147b   :  { %2851 = vmatpush3.bf16.msra.mxu0 %v3674_v27 }
0x147c   :  { %v2960_v10 = vpop.eup %2959  ;;  %2858 = vmatprep.subr.bf16.mxu0 %v3265_v0 }
0x147d   :  { %v1083_v11 = vadd.f32 1.0, %v2960_v10 }
0x147f   :  { %2961 = vrcp.f32 %v1083_v11 }
0x1489   :  { %v2962_v13 = vpop.eup %2961 }
0x148a   :  { %v1097_v42 = vsub.f32 1.0, %v2962_v13  ;;  %v1103_v45 = vmul.f32 %v2962_v13, %v3647_v36 }
0x14e0   :  { %v1088_v14 = vpop.permute.xlu1 %1087 }
0x14e1   :  { %v1090_v15 = vmul.f32 %v2962_v13, %v1088_v14 }
0x14e3   :  { %1092 = vrot.lane.b32.xlu0 %v1090_v15, %s3268_s4 }
0x1549   :  { %v1341_v36 = vpop.f32.mrb[10].mxu0 }
0x154a   :  { %v1342_v4 = vadd.f32 %v3729_v3, %v1341_v36  ;;  %v2674_v43 = vpop.f32.mrb[11].mxu0 }
0x1555   :  { %v1093_v16 = vpop.permute.xlu0 %1092 }
0x1556   :  { %v1095_v17 = vadd.f32 %v1093_v16, %v3542_v44  ;;  %v1162_v44 = vld [vmem:[%s3959_s6 + $0x18] sm:$0xff] }
0x1557   :  { %v2830_v29 = vpack.c.bf16 %v1162_v44, %v1161_v26 }
0x1558   :  { %2963 = vtanh.f32 %v1095_v17 }
0x1559   :  { %2831 = vmatprep.subr.bf16.mxu1 %v2830_v29 }
0x155a   :  { %2833 = vmatpush3.bf16.msra.mxu1 %v2830_v29 }
0x155b   :  { %2840 = vmatprep.subr.bf16.mxu1 %v3265_v0 }
0x1562   :  { %v2964_v8 = vpop.eup %2963 }
0x1563   :  { %1099 = vrot.lane.b32.xlu1 %v2964_v8, %s3269_s18 }
0x15d5   :  { %v1100_v38 = vpop.permute.xlu1 %1099 }
0x15d6   :  { %v1102_v49 = vmul.f32 %v1100_v38, %v1097_v42 }
0x15d8   :  { %v3713_v52 = vadd.f32 %v1103_v45, %v1102_v49 }
0x15da   :  { %v1123_v55 = vrot.slane %v3713_v52, 1  ;;  %v1137_v57 = vrot.slane %v3713_v52, 2 }
0x15dc   :  { %v1151_v62 = vsel %vm1150_vm9, %v1149_v59, %v1123_v55  ;;  %v1158_v63 = vsel %vm1150_vm9, %v1157_v61, %v1137_v57 }
0x15dd   :  { %1177 = vrot.lane.b32.xlu0 %v1151_v62, %s3269_s18  ;;  %1179 = vrot.lane.b32.xlu1 %v1158_v63, %s3269_s18 }
0x15e1   :  { %1353 = vrot.lane.b32.xlu0 %v1342_v4, %s3268_s4 }
0x164f   :  { %v1178_v5 = vpop.permute.xlu0 %1177  ;;  %v1180_v6 = vpop.permute.xlu1 %1179 }
0x1650   :  { %2661 = vmatprep.mubr.msk.f32.mxu1 %vm261_vm2, %v1178_v5 }
0x1651   :  { %2662 = vmatmul.mubr.msk.f32.vlgmr.msra.gmra.mrb[8].mxu1 %vm261_vm2, %v1180_v6 }
0x1652   :  { %2842 = vmatpush3.bf16.msra.mxu1 %v3659_v22  ;;  %2683 = vmatprep.mubr.msk.f32.mxu1 %vm3266_vm0, %v3267_v1 }
0x1653   :  { %2843 = vmatprep.subr.bf16.mxu1 %v3265_v0  ;;  %v1354_v48 = vpop.permute.xlu0 %1353 }
0x1656   :  { %2845 = vmatpush3.bf16.msra.mxu1 %v3674_v27 }
0x1657   :  { %2852 = vmatprep.subr.bf16.mxu1 %v3265_v0 }
0x1724   :  { %v2663_v9 = vpop.f32.mrb[8].mxu1 }
0x1725   :  { %v1257_v10 = vadd.f32 %v2663_v9, %v2427_v7  ;;  %v1251_v11 = vpop.f32.mrb[9].mxu1 }
0x1726   :  { %v1252_v13 = vadd.f32 %v2427_v7, %v1251_v11 }
0x1727   :  { %v1269_v14 = vrot.slane %v1257_v10, 7  ;;  %v1481_v15 = vrot.slane %v1257_v10, 1  ;;  %v1587_v16 = vrot.slane %v1257_v10, 2  ;;  %v1693_v17 = vrot.slane %v1257_v10, 3 }
0x1728   :  { %v1375_v19 = vrot.slane %v1252_v13, 1  ;;  %v1479_v18 = vrot.slane %v1252_v13, 2  ;;  %v1585_v21 = vrot.slane %v1252_v13, 3  ;;  %v1691_v23 = vrot.slane %v1252_v13, 4 }
0x1729   :  { %v1271_v25 = vsel %vm259_vm3, %v1252_v13, %v1269_v14  ;;  %v1797_v37 = vrot.slane %v1252_v13, 5  ;;  %v1799_v26 = vrot.slane %v1257_v10, 4  ;;  %v1903_v44 = vrot.slane %v1252_v13, 6 }
0x172a   :  { %v1345_v28 = vadd.f32 %v1342_v4, %v1271_v25  ;;  %v1377_v29 = vsel %vm259_vm3, %v1375_v19, %v1257_v10  ;;  %v3744_v8 = vsel %vm259_vm3, %v1479_v18, %v1481_v15  ;;  %v3747_v31 = vsel %vm259_vm3, %v1585_v21, %v1587_v16 }
0x172b   :  { %v3750_v32 = vsel %vm259_vm3, %v1691_v23, %v1693_v17  ;;  %v3753_v33 = vsel %vm259_vm3, %v1797_v37, %v1799_v26  ;;  %v1905_v12 = vrot.slane %v1257_v10, 5  ;;  %v2009_v34 = vrot.slane %v1252_v13, 7 }
0x172c   :  { %v2433_v39 = vmul.f32 -1.442695, %v1345_v28  ;;  %v2011_v40 = vrot.slane %v1257_v10, 6 }
0x172d   :  { %v3756_v41 = vsel %vm259_vm3, %v1903_v44, %v1905_v12 }
0x172e   :  { %2965 = vpow2.f32 %v2433_v39  ;;  %v3759_v42 = vsel %vm259_vm3, %v2009_v34, %v2011_v40 }
0x1738   :  { %v2966_v46 = vpop.eup %2965 }
0x1739   :  { %v1349_v47 = vadd.f32 1.0, %v2966_v46 }
0x173b   :  { %2967 = vrcp.f32 %v1349_v47 }
0x1745   :  { %v2968_v38 = vpop.eup %2967 }
0x1746   :  { %v1356_v60 = vmul.f32 %v2968_v38, %v1354_v48  ;;  %v1363_v2 = vsub.f32 1.0, %v2968_v38 }
0x1748   :  { %1358 = vrot.lane.b32.xlu1 %v1356_v60, %s3268_s4 }
0x174c   :  { %1369 = vrot.lane.b32.xlu1 %v3682_v30, %s3270_s22 }
0x17ba   :  { %v1359_v20 = vpop.permute.xlu1 %1358 }
0x17bb   :  { %v1361_v45 = vadd.f32 %v1359_v20, %v1271_v25 }
0x17bd   :  { %2969 = vtanh.f32 %v1361_v45 }
0x17be   :  { %v1370_v50 = vpop.permute.xlu1 %1369 }
0x17bf   :  { %v1372_v24 = vmul.f32 %v2968_v38, %v1370_v50 }
0x17c7   :  { %v2970_v49 = vpop.eup %2969 }
0x17c8   :  { %1365 = vrot.lane.b32.xlu0 %v2970_v49, %s3269_s18 }
0x183a   :  { %v1366_v51 = vpop.permute.xlu0 %1365 }
0x183b   :  { %v1368_v53 = vmul.f32 %v1366_v51, %v1363_v2 }
0x183d   :  { %v3765_v54 = vadd.f32 %v1372_v24, %v1368_v53 }
0x183f   :  { %1379 = vrot.lane.b32.xlu0 %v3765_v54, %s3269_s18 }
0x18b1   :  { %v1380_v35 = vpop.permute.xlu0 %1379 }
0x18b2   :  { %2684 = vmatmul.mubr.msk.f32.vlgmr.msra.gmra.mrb[10].mxu1 %vm261_vm2, %v1380_v35 }
0x18b3   :  { %2854 = vmatpush3.bf16.msra.mxu1 %v3659_v22  ;;  %2705 = vmatprep.mubr.msk.f32.mxu1 %vm3266_vm0, %v3267_v1 }
0x18b4   :  { %2855 = vmatprep.subr.bf16.mxu1 %v3265_v0 }
0x18b7   :  { %2857 = vmatpush3.bf16.msra.mxu1 %v3674_v27 }
0x18b8   :  { %2864 = vmatprep.subr.bf16.mxu1 %v3265_v0 }
0x1985   :  { %v1449_v30 = vpop.f32.mrb[10].mxu1 }
0x1986   :  { %v1450_v55 = vadd.f32 %v3729_v3, %v1449_v30  ;;  %v2685_v56 = vpop.f32.mrb[11].mxu1 }
0x1988   :  { %1461 = vrot.lane.b32.xlu1 %v1450_v55, %s3268_s4  ;;  %v1453_v57 = vadd.f32 %v1450_v55, %v1377_v29 }
0x198a   :  { %v2435_v58 = vmul.f32 -1.442695, %v1453_v57 }
0x198c   :  { %2971 = vpow2.f32 %v2435_v58 }
0x1996   :  { %v2972_v59 = vpop.eup %2971 }
0x1997   :  { %v1457_v61 = vadd.f32 1.0, %v2972_v59 }
0x1999   :  { %2973 = vrcp.f32 %v1457_v61 }
0x19a3   :  { %v2974_v62 = vpop.eup %2973 }
0x19a4   :  { %v1471_v6 = vsub.f32 1.0, %v2974_v62  ;;  %v1477_v9 = vmul.f32 %v2974_v62, %v3765_v54 }
0x19fa   :  { %v1462_v63 = vpop.permute.xlu1 %1461 }
0x19fb   :  { %v1464_v36 = vmul.f32 %v2974_v62, %v1462_v63 }
0x19fd   :  { %1466 = vrot.lane.b32.xlu0 %v1464_v36, %s3268_s4 }
0x1a6f   :  { %v1467_v4 = vpop.permute.xlu0 %1466 }
0x1a70   :  { %v1469_v43 = vadd.f32 %v1467_v4, %v1377_v29 }
0x1a72   :  { %2975 = vtanh.f32 %v1469_v43 }
0x1a7c   :  { %v2976_v5 = vpop.eup %2975 }
0x1a7d   :  { %1473 = vrot.lane.b32.xlu1 %v2976_v5, %s3269_s18 }
0x1aef   :  { %v1474_v7 = vpop.permute.xlu1 %1473 }
0x1af0   :  { %v1476_v10 = vmul.f32 %v1474_v7, %v1471_v6 }
0x1af2   :  { %v3781_v11 = vadd.f32 %v1477_v9, %v1476_v10 }
0x1af4   :  { %1485 = vrot.lane.b32.xlu0 %v3781_v11, %s3269_s18 }
0x1b66   :  { %v1486_v13 = vpop.permute.xlu0 %1485 }
0x1b67   :  { %2695 = vmatmul.mubr.msk.f32.vlgmr.msra.gmra.mrb[12].mxu0 %vm261_vm2, %v1486_v13 }
0x1b68   :  { %2860 = vmatpush3.bf16.msra.mxu0 %v3659_v22  ;;  %2716 = vmatprep.mubr.msk.f32.mxu0 %vm3266_vm0, %v3267_v1 }
0x1b69   :  { %2861 = vmatprep.subr.bf16.mxu0 %v3265_v0 }
0x1b6c   :  { %2863 = vmatpush3.bf16.msra.mxu0 %v3674_v27 }
0x1b6d   :  { %2870 = vmatprep.subr.bf16.mxu0 %v3265_v0 }
0x1c3a   :  { %v1555_v14 = vpop.f32.mrb[12].mxu0 }
0x1c3b   :  { %v1556_v15 = vadd.f32 %v3729_v3, %v1555_v14  ;;  %v2696_v16 = vpop.f32.mrb[13].mxu0 }
0x1c3d   :  { %1567 = vrot.lane.b32.xlu1 %v1556_v15, %s3268_s4  ;;  %v1559_v17 = vadd.f32 %v1556_v15, %v3744_v8 }
0x1c3f   :  { %v2437_v19 = vmul.f32 -1.442695, %v1559_v17 }
0x1c41   :  { %2977 = vpow2.f32 %v2437_v19 }
0x1c4b   :  { %v2978_v18 = vpop.eup %2977 }
0x1c4c   :  { %v1563_v21 = vadd.f32 1.0, %v2978_v18 }
0x1c4e   :  { %2979 = vrcp.f32 %v1563_v21 }
0x1c58   :  { %v2980_v23 = vpop.eup %2979 }
0x1c59   :  { %v1577_v29 = vsub.f32 1.0, %v2980_v23  ;;  %v1583_v34 = vmul.f32 %v2980_v23, %v3781_v11 }
0x1caf   :  { %v1568_v25 = vpop.permute.xlu1 %1567 }
0x1cb0   :  { %v1570_v37 = vmul.f32 %v2980_v23, %v1568_v25 }
0x1cb2   :  { %1572 = vrot.lane.b32.xlu0 %v1570_v37, %s3268_s4 }
0x1d24   :  { %v1573_v26 = vpop.permute.xlu0 %1572 }
0x1d25   :  { %v1575_v44 = vadd.f32 %v1573_v26, %v3744_v8 }
0x1d27   :  { %2981 = vtanh.f32 %v1575_v44 }
0x1d31   :  { %v2982_v28 = vpop.eup %2981 }
0x1d32   :  { %1579 = vrot.lane.b32.xlu1 %v2982_v28, %s3269_s18 }
0x1da4   :  { %v1580_v12 = vpop.permute.xlu1 %1579 }
0x1da5   :  { %v1582_v39 = vmul.f32 %v1580_v12, %v1577_v29 }
0x1da7   :  { %v3799_v40 = vadd.f32 %v1583_v34, %v1582_v39 }
0x1da9   :  { %1591 = vrot.lane.b32.xlu0 %v3799_v40, %s3269_s18 }
0x1e1b   :  { %v1592_v46 = vpop.permute.xlu0 %1591 }
0x1e1c   :  { %2706 = vmatmul.mubr.msk.f32.vlgmr.msra.gmra.mrb[12].mxu1 %vm261_vm2, %v1592_v46 }
0x1e1d   :  { %2866 = vmatpush3.bf16.msra.mxu1 %v3659_v22  ;;  %2727 = vmatprep.mubr.msk.f32.mxu1 %vm3266_vm0, %v3267_v1 }
0x1e1e   :  { %2867 = vmatprep.subr.bf16.mxu1 %v3265_v0 }
0x1e21   :  { %2869 = vmatpush3.bf16.msra.mxu1 %v3674_v27 }
0x1e22   :  { %2876 = vmatprep.subr.bf16.mxu1 %v3265_v0 }
0x1eef   :  { %v1661_v8 = vpop.f32.mrb[12].mxu1 }
0x1ef0   :  { %v1662_v47 = vadd.f32 %v3729_v3, %v1661_v8  ;;  %v2707_v48 = vpop.f32.mrb[13].mxu1 }
0x1ef2   :  { %1673 = vrot.lane.b32.xlu1 %v1662_v47, %s3268_s4  ;;  %v1665_v38 = vadd.f32 %v1662_v47, %v3747_v31 }
0x1ef4   :  { %v2439_v60 = vmul.f32 -1.442695, %v1665_v38 }
0x1ef6   :  { %2983 = vpow2.f32 %v2439_v60 }
0x1f00   :  { %v2984_v20 = vpop.eup %2983 }
0x1f01   :  { %v1669_v45 = vadd.f32 1.0, %v2984_v20 }
0x1f03   :  { %2985 = vrcp.f32 %v1669_v45 }
0x1f0d   :  { %v2986_v49 = vpop.eup %2985 }
0x1f0e   :  { %v1683_v35 = vsub.f32 1.0, %v2986_v49  ;;  %v1689_v55 = vmul.f32 %v2986_v49, %v3799_v40 }
0x1f64   :  { %v1674_v50 = vpop.permute.xlu1 %1673 }
0x1f65   :  { %v1676_v2 = vmul.f32 %v2986_v49, %v1674_v50 }
0x1f67   :  { %1678 = vrot.lane.b32.xlu0 %v1676_v2, %s3268_s4 }
0x1fd9   :  { %v1679_v51 = vpop.permute.xlu0 %1678 }
0x1fda   :  { %v1681_v24 = vadd.f32 %v1679_v51, %v3747_v31 }
0x1fdc   :  { %2987 = vtanh.f32 %v1681_v24 }
0x1fe6   :  { %v2988_v53 = vpop.eup %2987 }
0x1fe7   :  { %1685 = vrot.lane.b32.xlu1 %v2988_v53, %s3269_s18 }
0x2059   :  { %v1686_v30 = vpop.permute.xlu1 %1685 }
0x205a   :  { %v1688_v56 = vmul.f32 %v1686_v30, %v1683_v35 }
0x205c   :  { %v3817_v57 = vadd.f32 %v1689_v55, %v1688_v56 }
0x205e   :  { %1697 = vrot.lane.b32.xlu0 %v3817_v57, %s3269_s18 }
0x20d0   :  { %v1698_v58 = vpop.permute.xlu0 %1697 }
0x20d1   :  { %2717 = vmatmul.mubr.msk.f32.vlgmr.msra.gmra.mrb[14].mxu0 %vm261_vm2, %v1698_v58 }
0x20d2   :  { %2872 = vmatpush3.bf16.msra.mxu0 %v3659_v22  ;;  %2738 = vmatprep.mubr.msk.f32.mxu0 %vm3266_vm0, %v3267_v1 }
0x20d3   :  { %2873 = vmatprep.subr.bf16.mxu0 %v3265_v0 }
0x20d6   :  { %2875 = vmatpush3.bf16.msra.mxu0 %v3674_v27 }
0x21a4   :  { %v1767_v31 = vpop.f32.mrb[14].mxu0 }
0x21a5   :  { %v1768_v59 = vadd.f32 %v3729_v3, %v1767_v31  ;;  %v2718_v61 = vpop.f32.mrb[15].mxu0 }
0x21a7   :  { %1779 = vrot.lane.b32.xlu1 %v1768_v59, %s3268_s4  ;;  %v1771_v62 = vadd.f32 %v1768_v59, %v3750_v32 }
0x21a9   :  { %v2441_v63 = vmul.f32 -1.442695, %v1771_v62 }
0x21ab   :  { %2989 = vpow2.f32 %v2441_v63 }
0x21b5   :  { %v2990_v36 = vpop.eup %2989 }
0x21b6   :  { %v1775_v4 = vadd.f32 1.0, %v2990_v36 }
0x21b8   :  { %2991 = vrcp.f32 %v1775_v4 }
0x21c2   :  { %v2992_v43 = vpop.eup %2991 }
0x21c3   :  { %v1789_v13 = vsub.f32 1.0, %v2992_v43  ;;  %v1795_v15 = vmul.f32 %v2992_v43, %v3817_v57 }
0x2219   :  { %v1780_v5 = vpop.permute.xlu1 %1779 }
0x221a   :  { %v1782_v6 = vmul.f32 %v2992_v43, %v1780_v5 }
0x221c   :  { %1784 = vrot.lane.b32.xlu0 %v1782_v6, %s3268_s4 }
0x228e   :  { %v1785_v7 = vpop.permute.xlu0 %1784 }
0x228f   :  { %v1787_v9 = vadd.f32 %v1785_v7, %v3750_v32 }
0x2291   :  { %2993 = vtanh.f32 %v1787_v9 }
0x229b   :  { %v2994_v10 = vpop.eup %2993 }
0x229c   :  { %1791 = vrot.lane.b32.xlu1 %v2994_v10, %s3269_s18  ;;  %v2164_v10 = vld [vmem:[#allocation11 + $0x8] sm:$0xff] }
0x230e   :  { %v1792_v14 = vpop.permute.xlu1 %1791 }
0x230f   :  { %v1794_v16 = vmul.f32 %v1792_v14, %v1789_v13  ;;  %v2165_v13 = vld [vmem:[#allocation11 + $0x10] sm:$0xff] }
0x2311   :  { %v3834_v17 = vadd.f32 %v1795_v15, %v1794_v16  ;;  %v2166_v16 = vld [vmem:[#allocation11 + $0x18] sm:$0xff] }
0x2313   :  { %1803 = vrot.lane.b32.xlu0 %v3834_v17, %s3269_s18 }
0x2385   :  { %v1804_v19 = vpop.permute.xlu0 %1803 }
0x2386   :  { %2728 = vmatmul.mubr.msk.f32.vlgmr.msra.gmra.mrb[14].mxu1 %vm261_vm2, %v1804_v19  ;;  %v2886_v19 = vpack.c.bf16 %v2166_v16, %v2165_v13 }
0x2387   :  { %2878 = vmatpush3.bf16.msra.mxu1 %v3659_v22  ;;  %2749 = vmatprep.mubr.msk.f32.mxu1 %vm3266_vm0, %v3267_v1 }
0x2388   :  { %2879 = vmatprep.subr.bf16.mxu1 %v3265_v0 }
0x238b   :  { %2881 = vmatpush3.bf16.msra.mxu1 %v3674_v27 }
0x2459   :  { %v1873_v32 = vpop.f32.mrb[14].mxu1 }
0x245a   :  { %v1874_v18 = vadd.f32 %v3729_v3, %v1873_v32  ;;  %v2729_v21 = vpop.f32.mrb[15].mxu1  ;;  %v2121_v32 = vrot.slane %v3781_v11, 7 }
0x245b   :  { %v2137_v21 = vrot.slane %v3799_v40, 7 }
0x245c   :  { %1885 = vrot.lane.b32.xlu1 %v1874_v18, %s3268_s4  ;;  %v1877_v23 = vadd.f32 %v1874_v18, %v3753_v33  ;;  %v2135_v18 = vrot.slane %v3765_v54, 1 }
0x245e   :  { %v2443_v25 = vmul.f32 -1.442695, %v1877_v23  ;;  %v2156_v23 = vsel %vm259_vm3, %v2135_v18, %v3781_v11  ;;  %v2141_v11 = vrot.slane %v3834_v17, 5 }
0x2460   :  { %2995 = vpow2.f32 %v2443_v25  ;;  %v2125_v25 = vrot.slane %v3817_v57, 5 }
0x246a   :  { %v2996_v37 = vpop.eup %2995 }
0x246b   :  { %v1881_v26 = vadd.f32 1.0, %v2996_v37  ;;  %v2139_v37 = vrot.slane %v3817_v57, 6 }
0x246d   :  { %2997 = vrcp.f32 %v1881_v26 }
0x2477   :  { %v2998_v22 = vpop.eup %2997 }
0x2478   :  { %v1895_v29 = vsub.f32 1.0, %v2998_v22  ;;  %v1901_v34 = vmul.f32 %v2998_v22, %v3834_v17 }
0x24ce   :  { %v1886_v44 = vpop.permute.xlu1 %1885 }
0x24cf   :  { %v1888_v1 = vmul.f32 %v2998_v22, %v1886_v44  ;;  %v2261_v22 = vld [vmem:[%s3965_s12] sm:$0xff]  ;;  %v2262_v44 = vld [vmem:[%s3965_s12 + $0x8] sm:$0xff] }
0x24d1   :  { %1890 = vrot.lane.b32.xlu0 %v1888_v1, %s3268_s4  ;;  %v2149_v1 = vsel %vm259_vm3, %v3765_v54, %v2121_v32  ;;  %v2157_v54 = vsel %vm1140_vm4, %v2156_v23, %v2137_v21 }
0x2543   :  { %v1891_v0 = vpop.permute.xlu0 %1890 }
0x2544   :  { %v1893_v27 = vadd.f32 %v1891_v0, %v3753_v33 }
0x2546   :  { %2999 = vtanh.f32 %v1893_v27  ;;  %v2890_v27 = vpack.c.bf16 %v2262_v44, %v2261_v22 }
0x2548   :  { %2891 = vmatprep.subr.bf16.mxu1 %v2890_v27 }
0x2550   :  { %v3000_v28 = vpop.eup %2999 }
0x2551   :  { %1897 = vrot.lane.b32.xlu1 %v3000_v28, %s3269_s18 }
0x25c3   :  { %v1898_v12 = vpop.permute.xlu1 %1897 }
0x25c4   :  { %v1900_v39 = vmul.f32 %v1898_v12, %v1895_v29 }
0x25c6   :  { %v3851_v46 = vadd.f32 %v1901_v34, %v1900_v39 }
0x25c8   :  { %1909 = vrot.lane.b32.xlu0 %v3851_v46, %s3269_s18  ;;  %v2129_v57 = vrot.slane %v3851_v46, 3  ;;  %v2143_v28 = vrot.slane %v3851_v46, 4 }
0x263a   :  { %v1910_v8 = vpop.permute.xlu0 %1909 }
0x263b   :  { %2739 = vmatmul.mubr.msk.f32.vlgmr.msra.gmra.mrb[16].mxu0 %vm261_vm2, %v1910_v8 }
0x270e   :  { %v1979_v47 = vpop.f32.mrb[16].mxu0 }
0x270f   :  { %v1980_v33 = vadd.f32 %v3729_v3, %v1979_v47  ;;  %v2740_v48 = vpop.f32.mrb[17].mxu0 }
0x2711   :  { %1991 = vrot.lane.b32.xlu1 %v1980_v33, %s3268_s4  ;;  %v1983_v38 = vadd.f32 %v1980_v33, %v3756_v41  ;;  %v2158_v33 = vsel %vm1142_vm5, %v2157_v54, %v2139_v37 }
0x2712   :  { %v2159_v48 = vsel %vm1144_vm6, %v2158_v33, %v2141_v11 }
0x2713   :  { %v2445_v60 = vmul.f32 -1.442695, %v1983_v38 }
0x2715   :  { %3001 = vpow2.f32 %v2445_v60 }
0x271f   :  { %v3002_v20 = vpop.eup %3001 }
0x2720   :  { %v1987_v45 = vadd.f32 1.0, %v3002_v20 }
0x2722   :  { %3003 = vrcp.f32 %v1987_v45  ;;  %v2160_v45 = vsel %vm1146_vm7, %v2159_v48, %v2143_v28 }
0x272c   :  { %v3004_v49 = vpop.eup %3003 }
0x272d   :  { %v2001_v35 = vsub.f32 1.0, %v3004_v49  ;;  %v2007_v55 = vmul.f32 %v3004_v49, %v3851_v46 }
0x2783   :  { %v1992_v50 = vpop.permute.xlu1 %1991 }
0x2784   :  { %v1994_v2 = vmul.f32 %v3004_v49, %v1992_v50 }
0x2786   :  { %1996 = vrot.lane.b32.xlu0 %v1994_v2, %s3268_s4 }
0x27f8   :  { %v1997_v51 = vpop.permute.xlu0 %1996 }
0x27f9   :  { %v1999_v24 = vadd.f32 %v1997_v51, %v3756_v41 }
0x27fb   :  { %3005 = vtanh.f32 %v1999_v24 }
0x2805   :  { %v3006_v53 = vpop.eup %3005 }
0x2806   :  { %2003 = vrot.lane.b32.xlu1 %v3006_v53, %s3269_s18 }
0x2878   :  { %v2004_v30 = vpop.permute.xlu1 %2003 }
0x2879   :  { %v2006_v56 = vmul.f32 %v2004_v30, %v2001_v35 }
0x287b   :  { %v3863_v58 = vadd.f32 %v2007_v55, %v2006_v56  ;;  %v2263_v55 = vld [vmem:[%s3965_s12 + $0x10] sm:$0xff] }
0x287d   :  { %2015 = vrot.lane.b32.xlu0 %v3863_v58, %s3269_s18  ;;  %v2131_v34 = vrot.slane %v3863_v58, 2  ;;  %v2145_v8 = vrot.slane %v3863_v58, 3 }
0x287f   :  { %v2161_v50 = vsel %vm1148_vm8, %v2160_v45, %v2145_v8 }
0x28ef   :  { %v2016_v31 = vpop.permute.xlu0 %2015 }
0x28f0   :  { %2750 = vmatmul.mubr.msk.f32.vlgmr.msra.gmra.mrb[16].mxu1 %vm261_vm2, %v2016_v31 }
0x28f1   :  { %2893 = vmatpush3.bf16.msra.mxu1 %v2890_v27 }
0x29c3   :  { %v2085_v59 = vpop.f32.mrb[16].mxu1 }
0x29c4   :  { %v2086_v41 = vadd.f32 %v3729_v3, %v2085_v59  ;;  %v2751_v61 = vpop.f32.mrb[17].mxu1  ;;  %v2163_v3 = vld [vmem:[#allocation11] sm:$0xff] }
0x29c5   :  { %v2882_v15 = vpack.c.bf16 %v2164_v10, %v2163_v3 }
0x29c6   :  { %2097 = vrot.lane.b32.xlu1 %v2086_v41, %s3268_s4  ;;  %v2089_v62 = vadd.f32 %v2086_v41, %v3759_v42 }
0x29c7   :  { %2883 = vmatprep.subr.bf16.mxu0 %v2882_v15 }
0x29c8   :  { %v2447_v63 = vmul.f32 -1.442695, %v2089_v62  ;;  %2885 = vmatpush3.bf16.msra.mxu0 %v2882_v15 }
0x29c9   :  { %2887 = vmatprep.subr.bf16.mxu0 %v2886_v19 }
0x29ca   :  { %3007 = vpow2.f32 %v2447_v63 }
0x29cc   :  { %2889 = vmatpush3.bf16.msra.mxu0 %v2886_v19 }
0x29d4   :  { %v3008_v36 = vpop.eup %3007 }
0x29d5   :  { %v2093_v4 = vadd.f32 1.0, %v3008_v36 }
0x29d7   :  { %3009 = vrcp.f32 %v2093_v4 }
0x29e1   :  { %v3010_v43 = vpop.eup %3009 }
0x29e2   :  { %v2107_v26 = vsub.f32 1.0, %v3010_v43  ;;  %v2113_v29 = vmul.f32 %v3010_v43, %v3863_v58  ;;  %v2448_v58 = vld [vmem:[#allocation13] ss:$0 sm:$0xff] }
0x2a38   :  { %v2098_v5 = vpop.permute.xlu1 %2097 }
0x2a39   :  { %v2100_v6 = vmul.f32 %v3010_v43, %v2098_v5 }
0x2a3b   :  { %2102 = vrot.lane.b32.xlu0 %v2100_v6, %s3268_s4 }
0x2aad   :  { %v2103_v7 = vpop.permute.xlu0 %2102 }
0x2aae   :  { %v2105_v9 = vadd.f32 %v2103_v7, %v3759_v42  ;;  %v2123_v42 = vrot.slane %v3799_v40, 6  ;;  %v2127_v40 = vrot.slane %v3834_v17, 4 }
0x2ab0   :  { %3011 = vtanh.f32 %v2105_v9  ;;  %v2150_v39 = vsel %vm1140_vm4, %v2149_v1, %v2123_v42 }
0x2ab1   :  { %v2151_v17 = vsel %vm1142_vm5, %v2150_v39, %v2125_v25 }
0x2ab2   :  { %v2152_v46 = vsel %vm1144_vm6, %v2151_v17, %v2127_v40 }
0x2ab3   :  { %v2153_v60 = vsel %vm1146_vm7, %v2152_v46, %v2129_v57 }
0x2ab4   :  { %v2154_v49 = vsel %vm1148_vm8, %v2153_v60, %v2131_v34 }
0x2aba   :  { %v3012_v14 = vpop.eup %3011 }
0x2abb   :  { %2109 = vrot.lane.b32.xlu1 %v3012_v14, %s3269_s18 }
0x2b2d   :  { %v2110_v0 = vpop.permute.xlu1 %2109 }
0x2b2e   :  { %v2112_v12 = vmul.f32 %v2110_v0, %v2107_v26 }
0x2b30   :  { %v2114_v47 = vadd.f32 %v2113_v29, %v2112_v12 }
0x2b32   :  { %v2133_v38 = vrot.slane %v2114_v47, 1  ;;  %v2147_v20 = vrot.slane %v2114_v47, 2 }
0x2b34   :  { %v2155_v2 = vsel %vm1150_vm9, %v2154_v49, %v2133_v38  ;;  %v2162_v51 = vsel %vm1150_vm9, %v2161_v50, %v2147_v20 }
0x2b35   :  { %2176 = vrot.lane.b32.xlu0 %v2155_v2, %s3269_s18  ;;  %2178 = vrot.lane.b32.xlu1 %v2162_v51, %s3269_s18 }
0x2b39   :  { %1106 = vrot.lane.b32.xlu0 %v3713_v52, %s3269_s18  ;;  %2116 = vrot.lane.b32.xlu1 %v2114_v47, %s3269_s18  ;;  %v2264_v52 = vld [vmem:[%s3965_s12 + $0x18] sm:$0xff] }
0x2b3a   :  { %v2894_v56 = vpack.c.bf16 %v2264_v52, %v2263_v55 }
0x2b3c   :  { %2895 = vmatprep.subr.bf16.mxu1 %v2894_v56 }
0x2b3d   :  { %2897 = vmatpush3.bf16.msra.mxu1 %v2894_v56 }
0x2ba7   :  { %v2177_v24 = vpop.permute.xlu0 %2176  ;;  %v2179_v53 = vpop.permute.xlu1 %2178 }
0x2ba8   :  { %2760 = vmatprep.mubr.msk.f32.mxu0 %vm261_vm2, %v2177_v24 }
0x2ba9   :  { %2761 = vmatmul.mubr.msk.f32.vlgmr.msra.gmra.mrb[18].mxu0 %vm261_vm2, %v2179_v53 }
0x2bab   :  { %v1107_v35 = vpop.permute.xlu0 %1106  ;;  %v2117_v30 = vpop.permute.xlu1 %2116 }
0x2bac   :  { %1110 = vst.msk [vmem:[#allocation17] sm:$0x3] %vm1109_vm10, %v1107_v35  ;;  %2120 = vst.msk [vmem:[#allocation17 + $0x2] sm:$0x3] %vm1109_vm10, %v2117_v30 }
0x2c7c   :  { %v2762_v31 = vpop.f32.mrb[18].mxu0 }
0x2c7d   :  { %v2256_v59 = vadd.f32 %v2762_v31, %v2448_v58  ;;  %v2250_v41 = vpop.f32.mrb[19].mxu0 }
0x2c7e   :  { %v2251_v61 = vadd.f32 %v2448_v58, %v2250_v41 }
0x2c7f   :  { %v2260_v63 = vmax.f32 %v2256_v59, 0.0 }
0x2c80   :  { %v2259_v62 = vmax.f32 %v2251_v61, 0.0 }
0x2c82   :  { %2771 = vmatprep.mubr.msk.f32.mxu1 %vm261_vm2, %v2259_v62 }
0x2c83   :  { %2772 = vmatmul.mubr.msk.f32.vlgmr.msra.gmra.mrb[18].mxu1 %vm261_vm2, %v2260_v63 }
0x2c84   :  { %3208 = shalt.err (!%p3205_p12)
}
0x2c85   :  { %s3209_s26 = scalar_lea.hbm %s3968_s15, 64 }
0x2c86   :  { %p3210_p13 = scmp.ne.s32.totalorder %s3968_s15, %s3209_s26  ;;  %p3213_p0 = scmp.lt.u32.totalorder %s3209_s26, %s3968_s15 }
0x2c88   :  { %p3215_p1 = pnand %p3213_p0, %p3210_p13 }
0x2c8a   :  { %3218 = shalt.err (!%p3215_p1)
}
0x2c8b   :  { %s3272_s24 = smov 2   ;;  %v2451_v36 = vld [vmem:[#allocation14] ss:$0 sm:$0xff]  ;;  %s3273_s13 = smov [#allocation16]   ;;  %vm2365_vm11 = vcmask 64512  }
0x2c8c   :  { %2392 = dma.vmem_to_hbm [thread:$0]  %s2387_s7, 64, %s3968_s15, [#allocation18], %s3270_s22, %s3270_s22, %s3272_s24  }
0x2c8d   :  { %s2374_s2 = sshll.u32 %s3273_s13, 4  ;;  %s2375_s2 = int_to_ptr.vmem [resolvable:$true] %s2374_s2 }
0x2c8e   :  { %s3219_s15 = scalar_lea.vmem %s2375_s2, 256  ;;  %p3224_p3 = scmp.lt.s32.totalorder %s2375_s2, %s2375_s2 }
0x2c8f   :  { %p3220_p2 = scmp.ne.s32.totalorder %s2375_s2, %s3219_s15  ;;  %p3225_p4 = scmp.lt.s32.totalorder %s3219_s15, %s3219_s15 }
0x2c91   :  { %p3226_p5 = por %p3225_p4, %p3224_p3 }
0x2c93   :  { %p3227_p6 = pnand %p3226_p5, %p3220_p2 }
0x2d56   :  { %v2773_v4 = vpop.f32.mrb[18].mxu1 }
0x2d57   :  { %v2350_v43 = vadd.f32 %v2773_v4, %v2451_v36  ;;  %v2344_v5 = vpop.f32.mrb[19].mxu1 }
0x2d58   :  { %v2345_v6 = vadd.f32 %v2451_v36, %v2344_v5 }
0x2d59   :  { %v2455_v7 = vmul.f32 -1.442695, %v2350_v43 }
0x2d5a   :  { %v2454_v9 = vmul.f32 -1.442695, %v2345_v6 }
0x2d5b   :  { %3013 = vpow2.f32 %v2455_v7 }
0x2d5c   :  { %3015 = vpow2.f32 %v2454_v9 }
0x2d65   :  { %v3014_v3 = vpop.eup %3013 }
0x2d66   :  { %v3016_v10 = vpop.eup %3015  ;;  %v2360_v13 = vadd.f32 1.0, %v3014_v3 }
0x2d67   :  { %v2359_v14 = vadd.f32 1.0, %v3016_v10 }
0x2d68   :  { %3017 = vrcp.f32 %v2360_v13 }
0x2d69   :  { %3019 = vrcp.f32 %v2359_v14 }
0x2d72   :  { %v3018_v15 = vpop.eup %3017 }
0x2d73   :  { %v3020_v16 = vpop.eup %3019  ;;  %2368 = vst.msk [vmem:[#allocation16 + $0x8] sm:$0xff] %vm2365_vm11, %v3018_v15 }
0x2d74   :  { %2366 = vst.msk [vmem:[#allocation16] sm:$0xff] %vm2365_vm11, %v3020_v16 }
0x2d75   :  { %3230 = shalt.err (!%p3227_p6)
}
0x2d76   :  { %s3231_s30 = scalar_lea.hbm %s3967_s14, 256 }
0x2d77   :  { %p3232_p7 = scmp.ne.s32.totalorder %s3967_s14, %s3231_s30  ;;  %p3235_p8 = scmp.lt.u32.totalorder %s3231_s30, %s3967_s14 }
0x2d79   :  { %p3237_p9 = pnand %p3235_p8, %p3232_p7 }
0x2d7b   :  { %3240 = shalt.err (!%p3237_p9)
}
0x2d7c   :  { %2380 = dma.vmem_to_hbm [thread:$0]  %s2375_s2, 256, %s3967_s14, [#allocation4], %s3259_s21, %s3259_s21, %s3260_s27  }
0x2d7d   :  { %3251 = dma.done.wait [#allocation4], 256  }
0x2d7e   :  { %3252 = vsyncadd [#allocation4], 4294967040 }
0x2d7f   :  { %3253 = dma.done.wait [#allocation18], 64  }
0x2d80   :  { %3254 = vsyncadd [#allocation18], 4294967232 }
0x2d81   :  { %2399 = vsyncpa [#allocation3], 1 }
0x2d82   :  { %2400 = vsyncpa [#allocation6], 1 }
0x2d83   :  { %2401 = vsyncpa [#allocation9], 1 }
0x2d84   :  { %2402 = vsyncpa [#allocation12], 1 }
0x2d85   :  { %2403 = vsyncpa [#allocation15], 1 }
0x2d86   :  { %2404 = vsyncpa [#allocation4], 1 }
0x2d87   :  { %2405 = vsyncpa [#allocation18], 1 }

</bundles_post_ra>
